<compile_context>
chip_gen: v6e
topology: v6e:2x2x1
jax: 0.10.0
libtpu: 0.0.40
codegen_flags: <defaults>
</compile_context>

<pallas_src>
import math
from functools import partial

import jax
import jax.numpy as jnp
from jax.experimental import pallas as pl
from jax.experimental.pallas import tpu as pltpu


# ---------------------------------------------------------------------------
# Helpers
# ---------------------------------------------------------------------------
def _layer_norm(x, w, b, eps):
    mean = jnp.mean(x, axis=-1, keepdims=True)
    xc = x - mean
    var = jnp.mean(xc * xc, axis=-1, keepdims=True)
    return xc * jax.lax.rsqrt(var + eps) * w + b


def _gelu(x):
    c = math.sqrt(2.0 / math.pi)
    return 0.5 * x * (1.0 + jnp.tanh(c * (x + 0.044715 * x * x * x)))


def _const_spec(shape, grid_rank, single_buffer):
    """BlockSpec for a grid-constant (replicated) input, single-buffered if
    the running JAX supports pipeline_mode=pl.Buffered(1)."""
    nd = len(shape)
    if grid_rank == 2:
        index_map = lambda b, r, _n=nd: (0,) * _n
    else:
        index_map = lambda b, qi, ki, _n=nd: (0,) * _n
    if single_buffer and hasattr(pl, "Buffered"):
        try:
            return pl.BlockSpec(shape, index_map, pipeline_mode=pl.Buffered(1))
        except Exception:
            return pl.BlockSpec(shape, index_map)
    return pl.BlockSpec(shape, index_map)


def _vmem_limit(estimate_bytes):
    return int(min(max(2 * estimate_bytes + (4 << 20), 16 << 20), 100 << 20))


# ---------------------------------------------------------------------------
# Kernel 1: K / V projection to head-major layout
# ---------------------------------------------------------------------------
def kv_proj_kernel(x_ref, wk_ref, wv_ref, kb_ref, vb_ref,
                   k_out_ref, v_out_ref, *, num_heads):
    xb = x_ref[0].astype(jnp.bfloat16)                       # (rt, H)
    for h in range(num_heads):                               # leading-axis only
        k_h = jnp.dot(xb, wk_ref[h],
                      preferred_element_type=jnp.float32) + kb_ref[h]
        v_h = jnp.dot(xb, wv_ref[h],
                      preferred_element_type=jnp.float32) + vb_ref[h]
        k_out_ref[0, h] = k_h.astype(k_out_ref.dtype)
        v_out_ref[0, h] = v_h.astype(v_out_ref.dtype)


# ---------------------------------------------------------------------------
# Kernel 2: flash attention + output dense + LN + GELU MLP + dense + LN
# ---------------------------------------------------------------------------
def attention_mlp_kernel(
    x_ref, mask_ref, k_ref, v_ref,
    wq_ref, wo_ref, wi_ref, wo2_ref,
    qb_ref, ob_ref, ib_ref, o2b_ref,
    ln1w_ref, ln1b_ref, ln2w_ref, ln2b_ref,
    out_ref,
    q_scr, m_scr, l_scr, acc_scr,
    *, num_heads, head_dim, eps, approx_recip,
):
    ki = pl.program_id(2)
    n_kt = pl.num_programs(2)

    # ---- per-(b, q-tile) init: Q projection (head-major) + softmax state ----
    @pl.when(ki == 0)
    def _():
        x = x_ref[0]                                        # (TQ, H) fp32
        xb = x.astype(jnp.bfloat16)
        scale = 1.0 / math.sqrt(head_dim)
        for h in range(num_heads):                          # head-major weights
            q_h = (jnp.dot(xb, wq_ref[h],
                           preferred_element_type=jnp.float32)
                   + qb_ref[h]) * scale
            q_scr[h] = q_h.astype(jnp.bfloat16)
        m_scr[...] = jnp.full_like(m_scr, -1e30)
        l_scr[...] = jnp.zeros_like(l_scr)
        acc_scr[...] = jnp.zeros_like(acc_scr)

    # ---- online-softmax update for this K/V tile ----------------------------
    k3 = k_ref[0]                                           # (nh, tk, dh) bf16
    v3 = v_ref[0]                                           # (nh, tk, dh) bf16
    s = jnp.einsum("hqd,hkd->hqk", q_scr[...], k3,
                   preferred_element_type=jnp.float32)      # (nh, TQ, tk)
    s = s + mask_ref[0]                                     # (1, tk) additive
    m_prev = m_scr[...]
    m_new = jnp.maximum(m_prev, jnp.max(s, axis=-1, keepdims=True))
    alpha = jnp.exp(m_prev - m_new)
    p = jnp.exp(s - m_new)
    l_scr[...] = alpha * l_scr[...] + jnp.sum(p, axis=-1, keepdims=True)
    acc_scr[...] = alpha * acc_scr[...] + jnp.einsum(
        "hqk,hkd->hqd", p.astype(jnp.bfloat16), v3,
        preferred_element_type=jnp.float32)
    m_scr[...] = m_new

    # ---- finalize: dense + residual + LN, MLP + residual + LN ---------------
    @pl.when(ki == n_kt - 1)
    def _():
        x = x_ref[0]                                        # (TQ, H) fp32
        if approx_recip:
            inv_l = pl.reciprocal(l_scr[...], approx=True)
        else:
            inv_l = 1.0 / l_scr[...]
        ctx3 = acc_scr[...] * inv_l                         # (nh, TQ, dh) fp32

        # attention output dense, accumulated per head with head-major W_o
        attn = jnp.zeros_like(x)
        for h in range(num_heads):
            attn = attn + jnp.dot(ctx3[h].astype(jnp.bfloat16), wo_ref[h],
                                  preferred_element_type=jnp.float32)
        attn = attn + ob_ref[...]
        attn_out = _layer_norm(attn + x, ln1w_ref[...], ln1b_ref[...], eps)

        inter = jnp.dot(attn_out.astype(jnp.bfloat16), wi_ref[...],
                        preferred_element_type=jnp.float32) + ib_ref[...]
        inter = _gelu(inter)

        out_dense = jnp.dot(inter.astype(jnp.bfloat16), wo2_ref[...],
                            preferred_element_type=jnp.float32) + o2b_ref[...]
        out = _layer_norm(out_dense + attn_out, ln2w_ref[...], ln2b_ref[...], eps)
        out_ref[0] = out.astype(out_ref.dtype)


# ---------------------------------------------------------------------------
# One-time weight preparation (head-major layouts, bf16 matmul weights)
# ---------------------------------------------------------------------------
def prepare_params(params, num_heads):
    H = params["w_q"].shape[0]
    dh = H // num_heads

    def head_major_in(w):   # (out,in) torch layout -> (nh, in, dh) bf16
        return (jnp.asarray(w, jnp.float32).T
                .reshape(H, num_heads, dh).transpose(1, 0, 2)
                .astype(jnp.bfloat16))

    def head_major_out(w):  # (out=H, in=H) torch layout -> (nh, dh, H) bf16
        return (jnp.asarray(w, jnp.float32).T
                .reshape(num_heads, dh, H).astype(jnp.bfloat16))

    def head_bias(b):       # (1, H) -> (nh, 1, dh) fp32
        return jnp.asarray(b, jnp.float32).reshape(num_heads, dh)[:, None, :]

    return {
        "wq": head_major_in(params["w_q"]),
        "wk": head_major_in(params["w_k"]),
        "wv": head_major_in(params["w_v"]),
        "wo": head_major_out(params["w_attn_out"]),
        "wi": jnp.asarray(params["w_inter"], jnp.float32).T.astype(jnp.bfloat16),
        "wo2": jnp.asarray(params["w_enc_out"], jnp.float32).T.astype(jnp.bfloat16),
        "qb": head_bias(params["q_bias"]),
        "kb": head_bias(params["k_bias"]),
        "vb": head_bias(params["v_bias"]),
        "ob": jnp.asarray(params["attn_out_bias"], jnp.float32),
        "ib": jnp.asarray(params["inter_bias"], jnp.float32),
        "o2b": jnp.asarray(params["enc_out_bias"], jnp.float32),
        "ln1w": jnp.asarray(params["attn_norm_w"], jnp.float32),
        "ln1b": jnp.asarray(params["attn_norm_b"], jnp.float32),
        "ln2w": jnp.asarray(params["enc_norm_w"], jnp.float32),
        "ln2b": jnp.asarray(params["enc_norm_b"], jnp.float32),
    }


# ---------------------------------------------------------------------------
# Wrapper
# ---------------------------------------------------------------------------
def fused_encoder_layer(hidden_states, attention_mask, prepped, *, num_heads,
                        eps=1e-5, q_tile=None, kv_tile=None, row_tile=None,
                        approx_reciprocal=True):
    B, S, H = hidden_states.shape
    inter_size = prepped["wi"].shape[1]
    assert H % num_heads == 0
    nh = num_heads
    dh = H // nh

    # Tile selection: keep the matmul M dimension large (review: >=256 when S allows).
    q_tile = min(256, S) if q_tile is None else q_tile
    kv_tile = min(512, S) if kv_tile is None else kv_tile
    row_tile = min(256, S) if row_tile is None else row_tile
    assert S % q_tile == 0 and (q_tile % 8 == 0 or q_tile == S)
    assert S % kv_tile == 0 and (kv_tile % 128 == 0 or kv_tile == S)
    assert S % row_tile == 0 and (row_tile % 8 == 0 or row_tile == S)
    n_qt, n_kt, n_rt = S // q_tile, S // kv_tile, S // row_tile

    x = hidden_states.astype(jnp.float32)
    mask = attention_mask.reshape(B, 1, S).astype(jnp.float32)

    # ---- VMEM budgets -------------------------------------------------------
    vmem_a = _vmem_limit(2 * 2 * H * H + 2 * 4 * H
                         + 4 * row_tile * H + 2 * 2 * nh * row_tile * dh)
    vmem_b = _vmem_limit(2 * (2 * H * H + 2 * H * inter_size)
                         + 4 * 2 * q_tile * H + 2 * 2 * nh * kv_tile * dh
                         + (2 + 4) * nh * q_tile * dh + 2 * 4 * nh * q_tile * 128
                         + 4 * q_tile * inter_size)

    # ---- cost estimates -----------------------------------------------------
    cost_a = pl.CostEstimate(
        flops=int(4 * B * S * H * H),
        transcendentals=0,
        bytes_accessed=int(4 * B * S * H + 4 * B * S * H + 4 * H * H + 8 * H))
    cost_b = pl.CostEstimate(
        flops=int(B * S * (4 * H * H + 4 * S * H + 4 * H * inter_size)),
        transcendentals=int(B * (nh * S * S + S * inter_size)),
        bytes_accessed=int(2 * (2 * H * H + 2 * H * inter_size)
                           + 8 * B * S * H + n_qt * 4 * B * S * H + 4 * B * S))

    def _kv_call(single_buffer):
        def cspec(shape):
            return _const_spec(shape, 2, single_buffer)
        return pl.pallas_call(
            partial(kv_proj_kernel, num_heads=nh),
            out_shape=(jax.ShapeDtypeStruct((B, nh, S, dh), jnp.bfloat16),
                       jax.ShapeDtypeStruct((B, nh, S, dh), jnp.bfloat16)),
            grid=(B, n_rt),
            in_specs=[
                pl.BlockSpec((1, row_tile, H), lambda b, r: (b, r, 0)),
                cspec((nh, H, dh)), cspec((nh, H, dh)),
                cspec((nh, 1, dh)), cspec((nh, 1, dh)),
            ],
            out_specs=(
                pl.BlockSpec((1, nh, row_tile, dh), lambda b, r: (b, 0, r, 0)),
                pl.BlockSpec((1, nh, row_tile, dh), lambda b, r: (b, 0, r, 0)),
            ),
            compiler_params=pltpu.CompilerParams(
                dimension_semantics=("parallel", "parallel"),
                vmem_limit_bytes=vmem_a),
            cost_estimate=cost_a,
        )(x, prepped["wk"], prepped["wv"], prepped["kb"], prepped["vb"])

    def _attn_call(k_hm, v_hm, single_buffer):
        def cspec(shape):
            return _const_spec(shape, 3, single_buffer)
        kernel = partial(attention_mlp_kernel, num_heads=nh, head_dim=dh,
                         eps=eps, approx_recip=approx_reciprocal)
        return pl.pallas_call(
            kernel,
            out_shape=jax.ShapeDtypeStruct((B, S, H), jnp.float32),
            grid=(B, n_qt, n_kt),
            in_specs=[
                pl.BlockSpec((1, q_tile, H), lambda b, qi, ki: (b, qi, 0)),
                pl.BlockSpec((1, 1, kv_tile), lambda b, qi, ki: (b, 0, ki)),
                pl.BlockSpec((1, nh, kv_tile, dh), lambda b, qi, ki: (b, 0, ki, 0)),
                pl.BlockSpec((1, nh, kv_tile, dh), lambda b, qi, ki: (b, 0, ki, 0)),
                cspec((nh, H, dh)),                        # Wq (head-major)
                cspec((nh, dh, H)),                        # Wo (head-major)
                cspec((H, inter_size)),                    # Wi
                cspec((inter_size, H)),                    # Wo2
                cspec((nh, 1, dh)),                        # q bias (head-major)
                cspec((1, H)), cspec((1, inter_size)), cspec((1, H)),
                cspec((1, H)), cspec((1, H)), cspec((1, H)), cspec((1, H)),
            ],
            out_specs=pl.BlockSpec((1, q_tile, H), lambda b, qi, ki: (b, qi, 0)),
            scratch_shapes=[
                pltpu.VMEM((nh, q_tile, dh), jnp.bfloat16),   # Q (head-major)
                pltpu.VMEM((nh, q_tile, 1), jnp.float32),     # running max
                pltpu.VMEM((nh, q_tile, 1), jnp.float32),     # running denom
                pltpu.VMEM((nh, q_tile, dh), jnp.float32),    # context acc
            ],
            compiler_params=pltpu.CompilerParams(
                dimension_semantics=("parallel", "parallel", "arbitrary"),
                vmem_limit_bytes=vmem_b),
            cost_estimate=cost_b,
        )(x, mask, k_hm, v_hm,
          prepped["wq"], prepped["wo"], prepped["wi"], prepped["wo2"],
          prepped["qb"], prepped["ob"], prepped["ib"], prepped["o2b"],
          prepped["ln1w"], prepped["ln1b"], prepped["ln2w"], prepped["ln2b"])

    def _run(single_buffer):
        k_hm, v_hm = _kv_call(single_buffer)
        return _attn_call(k_hm, v_hm, single_buffer)

    try:
        return _run(True)
    except Exception:
        # Fallback for JAX versions without single-buffer pipeline_mode support.
        return _run(False)


# ---------------------------------------------------------------------------
# Pure-JAX reference (mirrors the kernel's bf16-operand / fp32-accum policy)
# ---------------------------------------------------------------------------
def reference_layer(hidden_states, attention_mask, p, *, num_heads, eps=1e-5):
    B, S, H = hidden_states.shape
    dh = H // num_heads
    x = hidden_states.astype(jnp.float32)
    m = attention_mask.reshape(B, 1, 1, S).astype(jnp.float32)

    def bmm(a, w):
        return jnp.dot(a.astype(jnp.bfloat16), w.astype(jnp.bfloat16),
                       preferred_element_type=jnp.float32)

    def lin(a, w_pt, b):  # w_pt is PyTorch-layout (out, in)
        return bmm(a, w_pt.T) + b.astype(jnp.float32)

    q = (lin(x, p["w_q"], p["q_bias"]) / math.sqrt(dh)
         ).reshape(B, S, num_heads, dh).transpose(0, 2, 1, 3)
    k = lin(x, p["w_k"], p["k_bias"]).reshape(B, S, num_heads, dh).transpose(0, 2, 1, 3)
    v = lin(x, p["w_v"], p["v_bias"]).reshape(B, S, num_heads, dh).transpose(0, 2, 1, 3)
    s = jnp.einsum("bhqd,bhkd->bhqk",
                   q.astype(jnp.bfloat16), k.astype(jnp.bfloat16),
                   preferred_element_type=jnp.float32) + m
    pr = jax.nn.softmax(s, axis=-1)
    ctx = jnp.einsum("bhqk,bhkd->bhqd",
                     pr.astype(jnp.bfloat16), v.astype(jnp.bfloat16),
                     preferred_element_type=jnp.float32)
    ctx = ctx.transpose(0, 2, 1, 3).reshape(B, S, H)

    def ln(a, w, b):
        mu = jnp.mean(a, -1, keepdims=True)
        var = jnp.mean((a - mu) ** 2, -1, keepdims=True)
        return ((a - mu) * jax.lax.rsqrt(var + eps) * w.astype(jnp.float32)
                + b.astype(jnp.float32))

    attn_out = ln(lin(ctx, p["w_attn_out"], p["attn_out_bias"]) + x,
                  p["attn_norm_w"], p["attn_norm_b"])
    inter = lin(attn_out, p["w_inter"], p["inter_bias"])
    c = math.sqrt(2.0 / math.pi)
    inter = 0.5 * inter * (1.0 + jnp.tanh(c * (inter + 0.044715 * inter ** 3)))
    out = ln(lin(inter, p["w_enc_out"], p["enc_out_bias"]) + attn_out,
             p["enc_norm_w"], p["enc_norm_b"])
    return out


# ---------------------------------------------------------------------------
# Main
# ---------------------------------------------------------------------------
def _make_params(key, H, INTER):
    ks = jax.random.split(key, 16)
    return {
        "w_q": 0.1 * jax.random.normal(ks[0], (H, H), jnp.float32),
        "w_k": 0.1 * jax.random.normal(ks[1], (H, H), jnp.float32),
        "w_v": 0.1 * jax.random.normal(ks[2], (H, H), jnp.float32),
        "w_attn_out": 0.1 * jax.random.normal(ks[3], (H, H), jnp.float32),
        "w_inter": 0.1 * jax.random.normal(ks[4], (INTER, H), jnp.float32),
        "w_enc_out": 0.1 * jax.random.normal(ks[5], (H, INTER), jnp.float32),
        "q_bias": 0.1 * jax.random.normal(ks[6], (1, H), jnp.float32),
        "k_bias": 0.1 * jax.random.normal(ks[7], (1, H), jnp.float32),
        "v_bias": 0.1 * jax.random.normal(ks[8], (1, H), jnp.float32),
        "attn_out_bias": 0.1 * jax.random.normal(ks[9], (1, H), jnp.float32),
        "inter_bias": 0.1 * jax.random.normal(ks[10], (1, INTER), jnp.float32),
        "enc_out_bias": 0.1 * jax.random.normal(ks[11], (1, H), jnp.float32),
        "attn_norm_w": 1.0 + 0.05 * jax.random.normal(ks[12], (1, H), jnp.float32),
        "attn_norm_b": 0.05 * jax.random.normal(ks[13], (1, H), jnp.float32),
        "enc_norm_w": 1.0 + 0.05 * jax.random.normal(ks[14], (1, H), jnp.float32),
        "enc_norm_b": 0.05 * jax.random.normal(ks[15], (1, H), jnp.float32),
    }


if __name__ == "__main__":
    EPS = 1e-5
    root = jax.random.PRNGKey(0)

    configs = [
        # (B, S, H, NH, INTER, q_tile, kv_tile)  small single-tile smoke test
        (2, 16, 32, 4, 64, None, None),
        # multi-tile flash path: 2 query tiles x 2 kv tiles
        (1, 256, 32, 4, 64, 128, 128),
    ]

    for idx, (B, S, H, NH, INTER, q_tile, kv_tile) in enumerate(configs):
        kparam, kx, kmask = jax.random.split(jax.random.fold_in(root, idx), 3)
        params = _make_params(kparam, H, INTER)
        hidden_states = jax.random.normal(kx, (B, S, H), jnp.float32)
        # additive attention mask (B, 1, 1, S): 0 for attend, -1e4 for masked
        mask_bits = (jax.random.uniform(kmask, (B, 1, 1, S)) < 0.9).astype(jnp.float32)
        attention_mask = (1.0 - mask_bits) * -1e4

        prepped = prepare_params(params, NH)   # one-time head-major / bf16 prep

        out = fused_encoder_layer(hidden_states, attention_mask, prepped,
                                  num_heads=NH, eps=EPS,
                                  q_tile=q_tile, kv_tile=kv_tile)
        out = jax.block_until_ready(out)

        ref = reference_layer(hidden_states, attention_mask, params,
                              num_heads=NH, eps=EPS)
        assert out.shape == (B, S, H)
        max_err = float(jnp.max(jnp.abs(out - ref)))
        assert jnp.allclose(out, ref, rtol=2e-2, atol=2e-2), \
            f"config {idx}: mismatch vs reference (max abs err {max_err})"

    print("KERNEL_OK")
</pallas_src>

<mosaic_0001>
module attributes {stable_mosaic.version = 11 : i64} {
  func.func @kv_proj_kernel(%arg0: i32, %arg1: i32, %arg2: memref<1x16x32xf32, #tpu.memory_space<vmem>>, %arg3: memref<4x32x8xbf16, #tpu.memory_space<vmem>>, %arg4: memref<4x32x8xbf16, #tpu.memory_space<vmem>>, %arg5: memref<4x1x8xf32, #tpu.memory_space<vmem>>, %arg6: memref<4x1x8xf32, #tpu.memory_space<vmem>>, %arg7: memref<1x4x16x8xbf16, #tpu.memory_space<vmem>>, %arg8: memref<1x4x16x8xbf16, #tpu.memory_space<vmem>>) attributes {dimension_semantics = [#tpu.dimension_semantics<parallel>, #tpu.dimension_semantics<parallel>], iteration_bounds = array<i64: 2, 1>, scalar_prefetch = 0 : i64, scratch_operands = 0 : i64, tpu.core_type = #tpu.core_type<tc>, window_params = [{transform_indices = @transform_0, window_bounds = array<i64: 1, 16, 32>}, {pipeline_mode = #tpu.pipeline_mode<synchronous>, transform_indices = @transform_1, window_bounds = array<i64: 4, 32, 8>}, {pipeline_mode = #tpu.pipeline_mode<synchronous>, transform_indices = @transform_2, window_bounds = array<i64: 4, 32, 8>}, {pipeline_mode = #tpu.pipeline_mode<synchronous>, transform_indices = @transform_3, window_bounds = array<i64: 4, 1, 8>}, {pipeline_mode = #tpu.pipeline_mode<synchronous>, transform_indices = @transform_4, window_bounds = array<i64: 4, 1, 8>}, {transform_indices = @transform_5, window_bounds = array<i64: 1, 4, 16, 8>}, {transform_indices = @transform_6, window_bounds = array<i64: 1, 4, 16, 8>}]} {
    %c0 = arith.constant 0 : index
    %c0_0 = arith.constant 0 : index
    %c0_1 = arith.constant 0 : index
    %0 = vector.load %arg2[%c0, %c0_0, %c0_1] : memref<1x16x32xf32, #tpu.memory_space<vmem>>, vector<1x16x32xf32>
    %1 = vector.shape_cast %0 : vector<1x16x32xf32> to vector<16x32xf32>
    %2 = arith.truncf %1 : vector<16x32xf32> to vector<16x32xbf16>
    %c0_2 = arith.constant 0 : index
    %c0_3 = arith.constant 0 : index
    %c0_4 = arith.constant 0 : index
    %3 = vector.load %arg3[%c0_2, %c0_3, %c0_4] : memref<4x32x8xbf16, #tpu.memory_space<vmem>>, vector<1x32x8xbf16>
    %4 = vector.shape_cast %3 : vector<1x32x8xbf16> to vector<32x8xbf16>
    %cst = arith.constant dense<0.000000e+00> : vector<16x8xf32>
    %5 = tpu.matmul %2, %4, %cst {dimension_numbers = #tpu.dot_dimension_numbers<[1], [0], [0], [1], [0, 0, 1, 1], [], []>} : vector<16x32xbf16>, vector<32x8xbf16>, vector<16x8xf32> -> vector<16x8xf32>
    %c0_5 = arith.constant 0 : index
    %c0_6 = arith.constant 0 : index
    %c0_7 = arith.constant 0 : index
    %6 = vector.load %arg5[%c0_5, %c0_6, %c0_7] : memref<4x1x8xf32, #tpu.memory_space<vmem>>, vector<1x1x8xf32>
    %7 = vector.shape_cast %6 : vector<1x1x8xf32> to vector<1x8xf32>
    %8 = vector.broadcast %7 : vector<1x8xf32> to vector<16x8xf32>
    %9 = arith.addf %5, %8 : vector<16x8xf32>
    %c0_8 = arith.constant 0 : index
    %c0_9 = arith.constant 0 : index
    %c0_10 = arith.constant 0 : index
    %10 = vector.load %arg4[%c0_8, %c0_9, %c0_10] : memref<4x32x8xbf16, #tpu.memory_space<vmem>>, vector<1x32x8xbf16>
    %11 = vector.shape_cast %10 : vector<1x32x8xbf16> to vector<32x8xbf16>
    %cst_11 = arith.constant dense<0.000000e+00> : vector<16x8xf32>
    %12 = tpu.matmul %2, %11, %cst_11 {dimension_numbers = #tpu.dot_dimension_numbers<[1], [0], [0], [1], [0, 0, 1, 1], [], []>} : vector<16x32xbf16>, vector<32x8xbf16>, vector<16x8xf32> -> vector<16x8xf32>
    %c0_12 = arith.constant 0 : index
    %c0_13 = arith.constant 0 : index
    %c0_14 = arith.constant 0 : index
    %13 = vector.load %arg6[%c0_12, %c0_13, %c0_14] : memref<4x1x8xf32, #tpu.memory_space<vmem>>, vector<1x1x8xf32>
    %14 = vector.shape_cast %13 : vector<1x1x8xf32> to vector<1x8xf32>
    %15 = vector.broadcast %14 : vector<1x8xf32> to vector<16x8xf32>
    %16 = arith.addf %12, %15 : vector<16x8xf32>
    %17 = arith.truncf %9 : vector<16x8xf32> to vector<16x8xbf16>
    %c0_15 = arith.constant 0 : index
    %c0_16 = arith.constant 0 : index
    %c0_17 = arith.constant 0 : index
    %c0_18 = arith.constant 0 : index
    %18 = vector.load %arg7[%c0_15, %c0_16, %c0_17, %c0_18] : memref<1x4x16x8xbf16, #tpu.memory_space<vmem>>, vector<1x1x16x8xbf16>
    %19 = vector.shape_cast %18 : vector<1x1x16x8xbf16> to vector<16x8xbf16>
    %20 = vector.shape_cast %17 : vector<16x8xbf16> to vector<1x1x16x8xbf16>
    tpu.vector_store %arg7[%c0_15, %c0_16, %c0_17, %c0_18], %20 {strides = array<i32>} : memref<1x4x16x8xbf16, #tpu.memory_space<vmem>>, vector<1x1x16x8xbf16>,
    %21 = arith.truncf %16 : vector<16x8xf32> to vector<16x8xbf16>
    %c0_19 = arith.constant 0 : index
    %c0_20 = arith.constant 0 : index
    %c0_21 = arith.constant 0 : index
    %c0_22 = arith.constant 0 : index
    %22 = vector.load %arg8[%c0_19, %c0_20, %c0_21, %c0_22] : memref<1x4x16x8xbf16, #tpu.memory_space<vmem>>, vector<1x1x16x8xbf16>
    %23 = vector.shape_cast %22 : vector<1x1x16x8xbf16> to vector<16x8xbf16>
    %24 = vector.shape_cast %21 : vector<16x8xbf16> to vector<1x1x16x8xbf16>
    tpu.vector_store %arg8[%c0_19, %c0_20, %c0_21, %c0_22], %24 {strides = array<i32>} : memref<1x4x16x8xbf16, #tpu.memory_space<vmem>>, vector<1x1x16x8xbf16>,
    %c1 = arith.constant 1 : index
    %c0_23 = arith.constant 0 : index
    %c0_24 = arith.constant 0 : index
    %25 = vector.load %arg3[%c1, %c0_23, %c0_24] : memref<4x32x8xbf16, #tpu.memory_space<vmem>>, vector<1x32x8xbf16>
    %26 = vector.shape_cast %25 : vector<1x32x8xbf16> to vector<32x8xbf16>
    %cst_25 = arith.constant dense<0.000000e+00> : vector<16x8xf32>
    %27 = tpu.matmul %2, %26, %cst_25 {dimension_numbers = #tpu.dot_dimension_numbers<[1], [0], [0], [1], [0, 0, 1, 1], [], []>} : vector<16x32xbf16>, vector<32x8xbf16>, vector<16x8xf32> -> vector<16x8xf32>
    %c1_26 = arith.constant 1 : index
    %c0_27 = arith.constant 0 : index
    %c0_28 = arith.constant 0 : index
    %28 = vector.load %arg5[%c1_26, %c0_27, %c0_28] : memref<4x1x8xf32, #tpu.memory_space<vmem>>, vector<1x1x8xf32>
    %29 = vector.shape_cast %28 : vector<1x1x8xf32> to vector<1x8xf32>
    %30 = vector.broadcast %29 : vector<1x8xf32> to vector<16x8xf32>
    %31 = arith.addf %27, %30 : vector<16x8xf32>
    %c1_29 = arith.constant 1 : index
    %c0_30 = arith.constant 0 : index
    %c0_31 = arith.constant 0 : index
    %32 = vector.load %arg4[%c1_29, %c0_30, %c0_31] : memref<4x32x8xbf16, #tpu.memory_space<vmem>>, vector<1x32x8xbf16>
    %33 = vector.shape_cast %32 : vector<1x32x8xbf16> to vector<32x8xbf16>
    %cst_32 = arith.constant dense<0.000000e+00> : vector<16x8xf32>
    %34 = tpu.matmul %2, %33, %cst_32 {dimension_numbers = #tpu.dot_dimension_numbers<[1], [0], [0], [1], [0, 0, 1, 1], [], []>} : vector<16x32xbf16>, vector<32x8xbf16>, vector<16x8xf32> -> vector<16x8xf32>
    %c1_33 = arith.constant 1 : index
    %c0_34 = arith.constant 0 : index
    %c0_35 = arith.constant 0 : index
    %35 = vector.load %arg6[%c1_33, %c0_34, %c0_35] : memref<4x1x8xf32, #tpu.memory_space<vmem>>, vector<1x1x8xf32>
    %36 = vector.shape_cast %35 : vector<1x1x8xf32> to vector<1x8xf32>
    %37 = vector.broadcast %36 : vector<1x8xf32> to vector<16x8xf32>
    %38 = arith.addf %34, %37 : vector<16x8xf32>
    %39 = arith.truncf %31 : vector<16x8xf32> to vector<16x8xbf16>
    %c0_36 = arith.constant 0 : index
    %c1_37 = arith.constant 1 : index
    %c0_38 = arith.constant 0 : index
    %c0_39 = arith.constant 0 : index
    %40 = vector.load %arg7[%c0_36, %c1_37, %c0_38, %c0_39] : memref<1x4x16x8xbf16, #tpu.memory_space<vmem>>, vector<1x1x16x8xbf16>
    %41 = vector.shape_cast %40 : vector<1x1x16x8xbf16> to vector<16x8xbf16>
    %42 = vector.shape_cast %39 : vector<16x8xbf16> to vector<1x1x16x8xbf16>
    tpu.vector_store %arg7[%c0_36, %c1_37, %c0_38, %c0_39], %42 {strides = array<i32>} : memref<1x4x16x8xbf16, #tpu.memory_space<vmem>>, vector<1x1x16x8xbf16>,
    %43 = arith.truncf %38 : vector<16x8xf32> to vector<16x8xbf16>
    %c0_40 = arith.constant 0 : index
    %c1_41 = arith.constant 1 : index
    %c0_42 = arith.constant 0 : index
    %c0_43 = arith.constant 0 : index
    %44 = vector.load %arg8[%c0_40, %c1_41, %c0_42, %c0_43] : memref<1x4x16x8xbf16, #tpu.memory_space<vmem>>, vector<1x1x16x8xbf16>
    %45 = vector.shape_cast %44 : vector<1x1x16x8xbf16> to vector<16x8xbf16>
    %46 = vector.shape_cast %43 : vector<16x8xbf16> to vector<1x1x16x8xbf16>
    tpu.vector_store %arg8[%c0_40, %c1_41, %c0_42, %c0_43], %46 {strides = array<i32>} : memref<1x4x16x8xbf16, #tpu.memory_space<vmem>>, vector<1x1x16x8xbf16>,
    %c2 = arith.constant 2 : index
    %c0_44 = arith.constant 0 : index
    %c0_45 = arith.constant 0 : index
    %47 = vector.load %arg3[%c2, %c0_44, %c0_45] : memref<4x32x8xbf16, #tpu.memory_space<vmem>>, vector<1x32x8xbf16>
    %48 = vector.shape_cast %47 : vector<1x32x8xbf16> to vector<32x8xbf16>
    %cst_46 = arith.constant dense<0.000000e+00> : vector<16x8xf32>
    %49 = tpu.matmul %2, %48, %cst_46 {dimension_numbers = #tpu.dot_dimension_numbers<[1], [0], [0], [1], [0, 0, 1, 1], [], []>} : vector<16x32xbf16>, vector<32x8xbf16>, vector<16x8xf32> -> vector<16x8xf32>
    %c2_47 = arith.constant 2 : index
    %c0_48 = arith.constant 0 : index
    %c0_49 = arith.constant 0 : index
    %50 = vector.load %arg5[%c2_47, %c0_48, %c0_49] : memref<4x1x8xf32, #tpu.memory_space<vmem>>, vector<1x1x8xf32>
    %51 = vector.shape_cast %50 : vector<1x1x8xf32> to vector<1x8xf32>
    %52 = vector.broadcast %51 : vector<1x8xf32> to vector<16x8xf32>
    %53 = arith.addf %49, %52 : vector<16x8xf32>
    %c2_50 = arith.constant 2 : index
    %c0_51 = arith.constant 0 : index
    %c0_52 = arith.constant 0 : index
    %54 = vector.load %arg4[%c2_50, %c0_51, %c0_52] : memref<4x32x8xbf16, #tpu.memory_space<vmem>>, vector<1x32x8xbf16>
    %55 = vector.shape_cast %54 : vector<1x32x8xbf16> to vector<32x8xbf16>
    %cst_53 = arith.constant dense<0.000000e+00> : vector<16x8xf32>
    %56 = tpu.matmul %2, %55, %cst_53 {dimension_numbers = #tpu.dot_dimension_numbers<[1], [0], [0], [1], [0, 0, 1, 1], [], []>} : vector<16x32xbf16>, vector<32x8xbf16>, vector<16x8xf32> -> vector<16x8xf32>
    %c2_54 = arith.constant 2 : index
    %c0_55 = arith.constant 0 : index
    %c0_56 = arith.constant 0 : index
    %57 = vector.load %arg6[%c2_54, %c0_55, %c0_56] : memref<4x1x8xf32, #tpu.memory_space<vmem>>, vector<1x1x8xf32>
    %58 = vector.shape_cast %57 : vector<1x1x8xf32> to vector<1x8xf32>
    %59 = vector.broadcast %58 : vector<1x8xf32> to vector<16x8xf32>
    %60 = arith.addf %56, %59 : vector<16x8xf32>
    %61 = arith.truncf %53 : vector<16x8xf32> to vector<16x8xbf16>
    %c0_57 = arith.constant 0 : index
    %c2_58 = arith.constant 2 : index
    %c0_59 = arith.constant 0 : index
    %c0_60 = arith.constant 0 : index
    %62 = vector.load %arg7[%c0_57, %c2_58, %c0_59, %c0_60] : memref<1x4x16x8xbf16, #tpu.memory_space<vmem>>, vector<1x1x16x8xbf16>
    %63 = vector.shape_cast %62 : vector<1x1x16x8xbf16> to vector<16x8xbf16>
    %64 = vector.shape_cast %61 : vector<16x8xbf16> to vector<1x1x16x8xbf16>
    tpu.vector_store %arg7[%c0_57, %c2_58, %c0_59, %c0_60], %64 {strides = array<i32>} : memref<1x4x16x8xbf16, #tpu.memory_space<vmem>>, vector<1x1x16x8xbf16>,
    %65 = arith.truncf %60 : vector<16x8xf32> to vector<16x8xbf16>
    %c0_61 = arith.constant 0 : index
    %c2_62 = arith.constant 2 : index
    %c0_63 = arith.constant 0 : index
    %c0_64 = arith.constant 0 : index
    %66 = vector.load %arg8[%c0_61, %c2_62, %c0_63, %c0_64] : memref<1x4x16x8xbf16, #tpu.memory_space<vmem>>, vector<1x1x16x8xbf16>
    %67 = vector.shape_cast %66 : vector<1x1x16x8xbf16> to vector<16x8xbf16>
    %68 = vector.shape_cast %65 : vector<16x8xbf16> to vector<1x1x16x8xbf16>
    tpu.vector_store %arg8[%c0_61, %c2_62, %c0_63, %c0_64], %68 {strides = array<i32>} : memref<1x4x16x8xbf16, #tpu.memory_space<vmem>>, vector<1x1x16x8xbf16>,
    %c3 = arith.constant 3 : index
    %c0_65 = arith.constant 0 : index
    %c0_66 = arith.constant 0 : index
    %69 = vector.load %arg3[%c3, %c0_65, %c0_66] : memref<4x32x8xbf16, #tpu.memory_space<vmem>>, vector<1x32x8xbf16>
    %70 = vector.shape_cast %69 : vector<1x32x8xbf16> to vector<32x8xbf16>
    %cst_67 = arith.constant dense<0.000000e+00> : vector<16x8xf32>
    %71 = tpu.matmul %2, %70, %cst_67 {dimension_numbers = #tpu.dot_dimension_numbers<[1], [0], [0], [1], [0, 0, 1, 1], [], []>} : vector<16x32xbf16>, vector<32x8xbf16>, vector<16x8xf32> -> vector<16x8xf32>
    %c3_68 = arith.constant 3 : index
    %c0_69 = arith.constant 0 : index
    %c0_70 = arith.constant 0 : index
    %72 = vector.load %arg5[%c3_68, %c0_69, %c0_70] : memref<4x1x8xf32, #tpu.memory_space<vmem>>, vector<1x1x8xf32>
    %73 = vector.shape_cast %72 : vector<1x1x8xf32> to vector<1x8xf32>
    %74 = vector.broadcast %73 : vector<1x8xf32> to vector<16x8xf32>
    %75 = arith.addf %71, %74 : vector<16x8xf32>
    %c3_71 = arith.constant 3 : index
    %c0_72 = arith.constant 0 : index
    %c0_73 = arith.constant 0 : index
    %76 = vector.load %arg4[%c3_71, %c0_72, %c0_73] : memref<4x32x8xbf16, #tpu.memory_space<vmem>>, vector<1x32x8xbf16>
    %77 = vector.shape_cast %76 : vector<1x32x8xbf16> to vector<32x8xbf16>
    %cst_74 = arith.constant dense<0.000000e+00> : vector<16x8xf32>
    %78 = tpu.matmul %2, %77, %cst_74 {dimension_numbers = #tpu.dot_dimension_numbers<[1], [0], [0], [1], [0, 0, 1, 1], [], []>} : vector<16x32xbf16>, vector<32x8xbf16>, vector<16x8xf32> -> vector<16x8xf32>
    %c3_75 = arith.constant 3 : index
    %c0_76 = arith.constant 0 : index
    %c0_77 = arith.constant 0 : index
    %79 = vector.load %arg6[%c3_75, %c0_76, %c0_77] : memref<4x1x8xf32, #tpu.memory_space<vmem>>, vector<1x1x8xf32>
    %80 = vector.shape_cast %79 : vector<1x1x8xf32> to vector<1x8xf32>
    %81 = vector.broadcast %80 : vector<1x8xf32> to vector<16x8xf32>
    %82 = arith.addf %78, %81 : vector<16x8xf32>
    %83 = arith.truncf %75 : vector<16x8xf32> to vector<16x8xbf16>
    %c0_78 = arith.constant 0 : index
    %c3_79 = arith.constant 3 : index
    %c0_80 = arith.constant 0 : index
    %c0_81 = arith.constant 0 : index
    %84 = vector.load %arg7[%c0_78, %c3_79, %c0_80, %c0_81] : memref<1x4x16x8xbf16, #tpu.memory_space<vmem>>, vector<1x1x16x8xbf16>
    %85 = vector.shape_cast %84 : vector<1x1x16x8xbf16> to vector<16x8xbf16>
    %86 = vector.shape_cast %83 : vector<16x8xbf16> to vector<1x1x16x8xbf16>
    tpu.vector_store %arg7[%c0_78, %c3_79, %c0_80, %c0_81], %86 {strides = array<i32>} : memref<1x4x16x8xbf16, #tpu.memory_space<vmem>>, vector<1x1x16x8xbf16>,
    %87 = arith.truncf %82 : vector<16x8xf32> to vector<16x8xbf16>
    %c0_82 = arith.constant 0 : index
    %c3_83 = arith.constant 3 : index
    %c0_84 = arith.constant 0 : index
    %c0_85 = arith.constant 0 : index
    %88 = vector.load %arg8[%c0_82, %c3_83, %c0_84, %c0_85] : memref<1x4x16x8xbf16, #tpu.memory_space<vmem>>, vector<1x1x16x8xbf16>
    %89 = vector.shape_cast %88 : vector<1x1x16x8xbf16> to vector<16x8xbf16>
    %90 = vector.shape_cast %87 : vector<16x8xbf16> to vector<1x1x16x8xbf16>
    tpu.vector_store %arg8[%c0_82, %c3_83, %c0_84, %c0_85], %90 {strides = array<i32>} : memref<1x4x16x8xbf16, #tpu.memory_space<vmem>>, vector<1x1x16x8xbf16>,
    return
  }
  func.func @transform_0(%arg0: i32, %arg1: i32) -> (i32, i32, i32) {
    %c0_i32 = arith.constant 0 : i32
    %c0_i32_0 = arith.constant 0 : i32
    return %arg0, %arg1, %c0_i32 : i32, i32, i32
  }
  func.func @transform_1(%arg0: i32, %arg1: i32) -> (i32, i32, i32) {
    %c0_i32 = arith.constant 0 : i32
    %c0_i32_0 = arith.constant 0 : i32
    %c0_i32_1 = arith.constant 0 : i32
    %c0_i32_2 = arith.constant 0 : i32
    return %c0_i32, %c0_i32_0, %c0_i32_1 : i32, i32, i32
  }
  func.func @transform_2(%arg0: i32, %arg1: i32) -> (i32, i32, i32) {
    %c0_i32 = arith.constant 0 : i32
    %c0_i32_0 = arith.constant 0 : i32
    %c0_i32_1 = arith.constant 0 : i32
    %c0_i32_2 = arith.constant 0 : i32
    return %c0_i32, %c0_i32_0, %c0_i32_1 : i32, i32, i32
  }
  func.func @transform_3(%arg0: i32, %arg1: i32) -> (i32, i32, i32) {
    %c0_i32 = arith.constant 0 : i32
    %c0_i32_0 = arith.constant 0 : i32
    %c0_i32_1 = arith.constant 0 : i32
    %c0_i32_2 = arith.constant 0 : i32
    return %c0_i32, %c0_i32_0, %c0_i32_1 : i32, i32, i32
  }
  func.func @transform_4(%arg0: i32, %arg1: i32) -> (i32, i32, i32) {
    %c0_i32 = arith.constant 0 : i32
    %c0_i32_0 = arith.constant 0 : i32
    %c0_i32_1 = arith.constant 0 : i32
    %c0_i32_2 = arith.constant 0 : i32
    return %c0_i32, %c0_i32_0, %c0_i32_1 : i32, i32, i32
  }
  func.func @transform_5(%arg0: i32, %arg1: i32) -> (i32, i32, i32, i32) {
    %c0_i32 = arith.constant 0 : i32
    %c0_i32_0 = arith.constant 0 : i32
    %c0_i32_1 = arith.constant 0 : i32
    return %arg0, %c0_i32, %arg1, %c0_i32_0 : i32, i32, i32, i32
  }
  func.func @transform_6(%arg0: i32, %arg1: i32) -> (i32, i32, i32, i32) {
    %c0_i32 = arith.constant 0 : i32
    %c0_i32_0 = arith.constant 0 : i32
    %c0_i32_1 = arith.constant 0 : i32
    return %arg0, %c0_i32, %arg1, %c0_i32_0 : i32, i32, i32, i32
  }
}

module attributes {stable_mosaic.version = 11 : i64} {
  func.func @kv_proj_kernel(%arg0: i32, %arg1: i32, %arg2: memref<1x16x32xf32, #tpu.memory_space<vmem>>, %arg3: memref<4x32x8xbf16, #tpu.memory_space<vmem>>, %arg4: memref<4x32x8xbf16, #tpu.memory_space<vmem>>, %arg5: memref<4x1x8xf32, #tpu.memory_space<vmem>>, %arg6: memref<4x1x8xf32, #tpu.memory_space<vmem>>, %arg7: memref<1x4x16x8xbf16, #tpu.memory_space<vmem>>, %arg8: memref<1x4x16x8xbf16, #tpu.memory_space<vmem>>) attributes {dimension_semantics = [#tpu.dimension_semantics<parallel>, #tpu.dimension_semantics<parallel>], iteration_bounds = array<i64: 2, 1>, scalar_prefetch = 0 : i64, scratch_operands = 0 : i64, tpu.core_type = #tpu.core_type<tc>, window_params = [{transform_indices = @transform_0, window_bounds = array<i64: 1, 16, 32>}, {pipeline_mode = #tpu.pipeline_mode<synchronous>, transform_indices = @transform_1, window_bounds = array<i64: 4, 32, 8>}, {pipeline_mode = #tpu.pipeline_mode<synchronous>, transform_indices = @transform_2, window_bounds = array<i64: 4, 32, 8>}, {pipeline_mode = #tpu.pipeline_mode<synchronous>, transform_indices = @transform_3, window_bounds = array<i64: 4, 1, 8>}, {pipeline_mode = #tpu.pipeline_mode<synchronous>, transform_indices = @transform_4, window_bounds = array<i64: 4, 1, 8>}, {transform_indices = @transform_5, window_bounds = array<i64: 1, 4, 16, 8>}, {transform_indices = @transform_6, window_bounds = array<i64: 1, 4, 16, 8>}]} {
    %c0 = arith.constant 0 : index
    %c0_0 = arith.constant 0 : index
    %c0_1 = arith.constant 0 : index
    %0 = vector.load %arg2[%c0, %c0_0, %c0_1] : memref<1x16x32xf32, #tpu.memory_space<vmem>>, vector<1x16x32xf32>
    %1 = vector.shape_cast %0 : vector<1x16x32xf32> to vector<16x32xf32>
    %2 = arith.truncf %1 : vector<16x32xf32> to vector<16x32xbf16>
    %c0_2 = arith.constant 0 : index
    %c0_3 = arith.constant 0 : index
    %c0_4 = arith.constant 0 : index
    %3 = vector.load %arg3[%c0_2, %c0_3, %c0_4] : memref<4x32x8xbf16, #tpu.memory_space<vmem>>, vector<1x32x8xbf16>
    %4 = vector.shape_cast %3 : vector<1x32x8xbf16> to vector<32x8xbf16>
    %cst = arith.constant dense<0.000000e+00> : vector<16x8xf32>
    %5 = tpu.matmul %2, %4, %cst {dimension_numbers = #tpu.dot_dimension_numbers<[1], [0], [0], [1], [0, 0, 1, 1], [], []>} : vector<16x32xbf16>, vector<32x8xbf16>, vector<16x8xf32> -> vector<16x8xf32>
    %c0_5 = arith.constant 0 : index
    %c0_6 = arith.constant 0 : index
    %c0_7 = arith.constant 0 : index
    %6 = vector.load %arg5[%c0_5, %c0_6, %c0_7] : memref<4x1x8xf32, #tpu.memory_space<vmem>>, vector<1x1x8xf32>
    %7 = vector.shape_cast %6 : vector<1x1x8xf32> to vector<1x8xf32>
    %8 = vector.broadcast %7 : vector<1x8xf32> to vector<16x8xf32>
    %9 = arith.addf %5, %8 : vector<16x8xf32>
    %c0_8 = arith.constant 0 : index
    %c0_9 = arith.constant 0 : index
    %c0_10 = arith.constant 0 : index
    %10 = vector.load %arg4[%c0_8, %c0_9, %c0_10] : memref<4x32x8xbf16, #tpu.memory_space<vmem>>, vector<1x32x8xbf16>
    %11 = vector.shape_cast %10 : vector<1x32x8xbf16> to vector<32x8xbf16>
    %cst_11 = arith.constant dense<0.000000e+00> : vector<16x8xf32>
    %12 = tpu.matmul %2, %11, %cst_11 {dimension_numbers = #tpu.dot_dimension_numbers<[1], [0], [0], [1], [0, 0, 1, 1], [], []>} : vector<16x32xbf16>, vector<32x8xbf16>, vector<16x8xf32> -> vector<16x8xf32>
    %c0_12 = arith.constant 0 : index
    %c0_13 = arith.constant 0 : index
    %c0_14 = arith.constant 0 : index
    %13 = vector.load %arg6[%c0_12, %c0_13, %c0_14] : memref<4x1x8xf32, #tpu.memory_space<vmem>>, vector<1x1x8xf32>
    %14 = vector.shape_cast %13 : vector<1x1x8xf32> to vector<1x8xf32>
    %15 = vector.broadcast %14 : vector<1x8xf32> to vector<16x8xf32>
    %16 = arith.addf %12, %15 : vector<16x8xf32>
    %17 = arith.truncf %9 : vector<16x8xf32> to vector<16x8xbf16>
    %c0_15 = arith.constant 0 : index
    %c0_16 = arith.constant 0 : index
    %c0_17 = arith.constant 0 : index
    %c0_18 = arith.constant 0 : index
    %18 = vector.load %arg7[%c0_15, %c0_16, %c0_17, %c0_18] : memref<1x4x16x8xbf16, #tpu.memory_space<vmem>>, vector<1x1x16x8xbf16>
    %19 = vector.shape_cast %18 : vector<1x1x16x8xbf16> to vector<16x8xbf16>
    %20 = vector.shape_cast %17 : vector<16x8xbf16> to vector<1x1x16x8xbf16>
    tpu.vector_store %arg7[%c0_15, %c0_16, %c0_17, %c0_18], %20 {strides = array<i32>} : memref<1x4x16x8xbf16, #tpu.memory_space<vmem>>, vector<1x1x16x8xbf16>,
    %21 = arith.truncf %16 : vector<16x8xf32> to vector<16x8xbf16>
    %c0_19 = arith.constant 0 : index
    %c0_20 = arith.constant 0 : index
    %c0_21 = arith.constant 0 : index
    %c0_22 = arith.constant 0 : index
    %22 = vector.load %arg8[%c0_19, %c0_20, %c0_21, %c0_22] : memref<1x4x16x8xbf16, #tpu.memory_space<vmem>>, vector<1x1x16x8xbf16>
    %23 = vector.shape_cast %22 : vector<1x1x16x8xbf16> to vector<16x8xbf16>
    %24 = vector.shape_cast %21 : vector<16x8xbf16> to vector<1x1x16x8xbf16>
    tpu.vector_store %arg8[%c0_19, %c0_20, %c0_21, %c0_22], %24 {strides = array<i32>} : memref<1x4x16x8xbf16, #tpu.memory_space<vmem>>, vector<1x1x16x8xbf16>,
    %c1 = arith.constant 1 : index
    %c0_23 = arith.constant 0 : index
    %c0_24 = arith.constant 0 : index
    %25 = vector.load %arg3[%c1, %c0_23, %c0_24] : memref<4x32x8xbf16, #tpu.memory_space<vmem>>, vector<1x32x8xbf16>
    %26 = vector.shape_cast %25 : vector<1x32x8xbf16> to vector<32x8xbf16>
    %cst_25 = arith.constant dense<0.000000e+00> : vector<16x8xf32>
    %27 = tpu.matmul %2, %26, %cst_25 {dimension_numbers = #tpu.dot_dimension_numbers<[1], [0], [0], [1], [0, 0, 1, 1], [], []>} : vector<16x32xbf16>, vector<32x8xbf16>, vector<16x8xf32> -> vector<16x8xf32>
    %c1_26 = arith.constant 1 : index
    %c0_27 = arith.constant 0 : index
    %c0_28 = arith.constant 0 : index
    %28 = vector.load %arg5[%c1_26, %c0_27, %c0_28] : memref<4x1x8xf32, #tpu.memory_space<vmem>>, vector<1x1x8xf32>
    %29 = vector.shape_cast %28 : vector<1x1x8xf32> to vector<1x8xf32>
    %30 = vector.broadcast %29 : vector<1x8xf32> to vector<16x8xf32>
    %31 = arith.addf %27, %30 : vector<16x8xf32>
    %c1_29 = arith.constant 1 : index
    %c0_30 = arith.constant 0 : index
    %c0_31 = arith.constant 0 : index
    %32 = vector.load %arg4[%c1_29, %c0_30, %c0_31] : memref<4x32x8xbf16, #tpu.memory_space<vmem>>, vector<1x32x8xbf16>
    %33 = vector.shape_cast %32 : vector<1x32x8xbf16> to vector<32x8xbf16>
    %cst_32 = arith.constant dense<0.000000e+00> : vector<16x8xf32>
    %34 = tpu.matmul %2, %33, %cst_32 {dimension_numbers = #tpu.dot_dimension_numbers<[1], [0], [0], [1], [0, 0, 1, 1], [], []>} : vector<16x32xbf16>, vector<32x8xbf16>, vector<16x8xf32> -> vector<16x8xf32>
    %c1_33 = arith.constant 1 : index
    %c0_34 = arith.constant 0 : index
    %c0_35 = arith.constant 0 : index
    %35 = vector.load %arg6[%c1_33, %c0_34, %c0_35] : memref<4x1x8xf32, #tpu.memory_space<vmem>>, vector<1x1x8xf32>
    %36 = vector.shape_cast %35 : vector<1x1x8xf32> to vector<1x8xf32>
    %37 = vector.broadcast %36 : vector<1x8xf32> to vector<16x8xf32>
    %38 = arith.addf %34, %37 : vector<16x8xf32>
    %39 = arith.truncf %31 : vector<16x8xf32> to vector<16x8xbf16>
    %c0_36 = arith.constant 0 : index
    %c1_37 = arith.constant 1 : index
    %c0_38 = arith.constant 0 : index
    %c0_39 = arith.constant 0 : index
    %40 = vector.load %arg7[%c0_36, %c1_37, %c0_38, %c0_39] : memref<1x4x16x8xbf16, #tpu.memory_space<vmem>>, vector<1x1x16x8xbf16>
    %41 = vector.shape_cast %40 : vector<1x1x16x8xbf16> to vector<16x8xbf16>
    %42 = vector.shape_cast %39 : vector<16x8xbf16> to vector<1x1x16x8xbf16>
    tpu.vector_store %arg7[%c0_36, %c1_37, %c0_38, %c0_39], %42 {strides = array<i32>} : memref<1x4x16x8xbf16, #tpu.memory_space<vmem>>, vector<1x1x16x8xbf16>,
    %43 = arith.truncf %38 : vector<16x8xf32> to vector<16x8xbf16>
    %c0_40 = arith.constant 0 : index
    %c1_41 = arith.constant 1 : index
    %c0_42 = arith.constant 0 : index
    %c0_43 = arith.constant 0 : index
    %44 = vector.load %arg8[%c0_40, %c1_41, %c0_42, %c0_43] : memref<1x4x16x8xbf16, #tpu.memory_space<vmem>>, vector<1x1x16x8xbf16>
    %45 = vector.shape_cast %44 : vector<1x1x16x8xbf16> to vector<16x8xbf16>
    %46 = vector.shape_cast %43 : vector<16x8xbf16> to vector<1x1x16x8xbf16>
    tpu.vector_store %arg8[%c0_40, %c1_41, %c0_42, %c0_43], %46 {strides = array<i32>} : memref<1x4x16x8xbf16, #tpu.memory_space<vmem>>, vector<1x1x16x8xbf16>,
    %c2 = arith.constant 2 : index
    %c0_44 = arith.constant 0 : index
    %c0_45 = arith.constant 0 : index
    %47 = vector.load %arg3[%c2, %c0_44, %c0_45] : memref<4x32x8xbf16, #tpu.memory_space<vmem>>, vector<1x32x8xbf16>
    %48 = vector.shape_cast %47 : vector<1x32x8xbf16> to vector<32x8xbf16>
    %cst_46 = arith.constant dense<0.000000e+00> : vector<16x8xf32>
    %49 = tpu.matmul %2, %48, %cst_46 {dimension_numbers = #tpu.dot_dimension_numbers<[1], [0], [0], [1], [0, 0, 1, 1], [], []>} : vector<16x32xbf16>, vector<32x8xbf16>, vector<16x8xf32> -> vector<16x8xf32>
    %c2_47 = arith.constant 2 : index
    %c0_48 = arith.constant 0 : index
    %c0_49 = arith.constant 0 : index
    %50 = vector.load %arg5[%c2_47, %c0_48, %c0_49] : memref<4x1x8xf32, #tpu.memory_space<vmem>>, vector<1x1x8xf32>
    %51 = vector.shape_cast %50 : vector<1x1x8xf32> to vector<1x8xf32>
    %52 = vector.broadcast %51 : vector<1x8xf32> to vector<16x8xf32>
    %53 = arith.addf %49, %52 : vector<16x8xf32>
    %c2_50 = arith.constant 2 : index
    %c0_51 = arith.constant 0 : index
    %c0_52 = arith.constant 0 : index
    %54 = vector.load %arg4[%c2_50, %c0_51, %c0_52] : memref<4x32x8xbf16, #tpu.memory_space<vmem>>, vector<1x32x8xbf16>
    %55 = vector.shape_cast %54 : vector<1x32x8xbf16> to vector<32x8xbf16>
    %cst_53 = arith.constant dense<0.000000e+00> : vector<16x8xf32>
    %56 = tpu.matmul %2, %55, %cst_53 {dimension_numbers = #tpu.dot_dimension_numbers<[1], [0], [0], [1], [0, 0, 1, 1], [], []>} : vector<16x32xbf16>, vector<32x8xbf16>, vector<16x8xf32> -> vector<16x8xf32>
    %c2_54 = arith.constant 2 : index
    %c0_55 = arith.constant 0 : index
    %c0_56 = arith.constant 0 : index
    %57 = vector.load %arg6[%c2_54, %c0_55, %c0_56] : memref<4x1x8xf32, #tpu.memory_space<vmem>>, vector<1x1x8xf32>
    %58 = vector.shape_cast %57 : vector<1x1x8xf32> to vector<1x8xf32>
    %59 = vector.broadcast %58 : vector<1x8xf32> to vector<16x8xf32>
    %60 = arith.addf %56, %59 : vector<16x8xf32>
    %61 = arith.truncf %53 : vector<16x8xf32> to vector<16x8xbf16>
    %c0_57 = arith.constant 0 : index
    %c2_58 = arith.constant 2 : index
    %c0_59 = arith.constant 0 : index
    %c0_60 = arith.constant 0 : index
    %62 = vector.load %arg7[%c0_57, %c2_58, %c0_59, %c0_60] : memref<1x4x16x8xbf16, #tpu.memory_space<vmem>>, vector<1x1x16x8xbf16>
    %63 = vector.shape_cast %62 : vector<1x1x16x8xbf16> to vector<16x8xbf16>
    %64 = vector.shape_cast %61 : vector<16x8xbf16> to vector<1x1x16x8xbf16>
    tpu.vector_store %arg7[%c0_57, %c2_58, %c0_59, %c0_60], %64 {strides = array<i32>} : memref<1x4x16x8xbf16, #tpu.memory_space<vmem>>, vector<1x1x16x8xbf16>,
    %65 = arith.truncf %60 : vector<16x8xf32> to vector<16x8xbf16>
    %c0_61 = arith.constant 0 : index
    %c2_62 = arith.constant 2 : index
    %c0_63 = arith.constant 0 : index
    %c0_64 = arith.constant 0 : index
    %66 = vector.load %arg8[%c0_61, %c2_62, %c0_63, %c0_64] : memref<1x4x16x8xbf16, #tpu.memory_space<vmem>>, vector<1x1x16x8xbf16>
    %67 = vector.shape_cast %66 : vector<1x1x16x8xbf16> to vector<16x8xbf16>
    %68 = vector.shape_cast %65 : vector<16x8xbf16> to vector<1x1x16x8xbf16>
    tpu.vector_store %arg8[%c0_61, %c2_62, %c0_63, %c0_64], %68 {strides = array<i32>} : memref<1x4x16x8xbf16, #tpu.memory_space<vmem>>, vector<1x1x16x8xbf16>,
    %c3 = arith.constant 3 : index
    %c0_65 = arith.constant 0 : index
    %c0_66 = arith.constant 0 : index
    %69 = vector.load %arg3[%c3, %c0_65, %c0_66] : memref<4x32x8xbf16, #tpu.memory_space<vmem>>, vector<1x32x8xbf16>
    %70 = vector.shape_cast %69 : vector<1x32x8xbf16> to vector<32x8xbf16>
    %cst_67 = arith.constant dense<0.000000e+00> : vector<16x8xf32>
    %71 = tpu.matmul %2, %70, %cst_67 {dimension_numbers = #tpu.dot_dimension_numbers<[1], [0], [0], [1], [0, 0, 1, 1], [], []>} : vector<16x32xbf16>, vector<32x8xbf16>, vector<16x8xf32> -> vector<16x8xf32>
    %c3_68 = arith.constant 3 : index
    %c0_69 = arith.constant 0 : index
    %c0_70 = arith.constant 0 : index
    %72 = vector.load %arg5[%c3_68, %c0_69, %c0_70] : memref<4x1x8xf32, #tpu.memory_space<vmem>>, vector<1x1x8xf32>
    %73 = vector.shape_cast %72 : vector<1x1x8xf32> to vector<1x8xf32>
    %74 = vector.broadcast %73 : vector<1x8xf32> to vector<16x8xf32>
    %75 = arith.addf %71, %74 : vector<16x8xf32>
    %c3_71 = arith.constant 3 : index
    %c0_72 = arith.constant 0 : index
    %c0_73 = arith.constant 0 : index
    %76 = vector.load %arg4[%c3_71, %c0_72, %c0_73] : memref<4x32x8xbf16, #tpu.memory_space<vmem>>, vector<1x32x8xbf16>
    %77 = vector.shape_cast %76 : vector<1x32x8xbf16> to vector<32x8xbf16>
    %cst_74 = arith.constant dense<0.000000e+00> : vector<16x8xf32>
    %78 = tpu.matmul %2, %77, %cst_74 {dimension_numbers = #tpu.dot_dimension_numbers<[1], [0], [0], [1], [0, 0, 1, 1], [], []>} : vector<16x32xbf16>, vector<32x8xbf16>, vector<16x8xf32> -> vector<16x8xf32>
    %c3_75 = arith.constant 3 : index
    %c0_76 = arith.constant 0 : index
    %c0_77 = arith.constant 0 : index
    %79 = vector.load %arg6[%c3_75, %c0_76, %c0_77] : memref<4x1x8xf32, #tpu.memory_space<vmem>>, vector<1x1x8xf32>
    %80 = vector.shape_cast %79 : vector<1x1x8xf32> to vector<1x8xf32>
    %81 = vector.broadcast %80 : vector<1x8xf32> to vector<16x8xf32>
    %82 = arith.addf %78, %81 : vector<16x8xf32>
    %83 = arith.truncf %75 : vector<16x8xf32> to vector<16x8xbf16>
    %c0_78 = arith.constant 0 : index
    %c3_79 = arith.constant 3 : index
    %c0_80 = arith.constant 0 : index
    %c0_81 = arith.constant 0 : index
    %84 = vector.load %arg7[%c0_78, %c3_79, %c0_80, %c0_81] : memref<1x4x16x8xbf16, #tpu.memory_space<vmem>>, vector<1x1x16x8xbf16>
    %85 = vector.shape_cast %84 : vector<1x1x16x8xbf16> to vector<16x8xbf16>
    %86 = vector.shape_cast %83 : vector<16x8xbf16> to vector<1x1x16x8xbf16>
    tpu.vector_store %arg7[%c0_78, %c3_79, %c0_80, %c0_81], %86 {strides = array<i32>} : memref<1x4x16x8xbf16, #tpu.memory_space<vmem>>, vector<1x1x16x8xbf16>,
    %87 = arith.truncf %82 : vector<16x8xf32> to vector<16x8xbf16>
    %c0_82 = arith.constant 0 : index
    %c3_83 = arith.constant 3 : index
    %c0_84 = arith.constant 0 : index
    %c0_85 = arith.constant 0 : index
    %88 = vector.load %arg8[%c0_82, %c3_83, %c0_84, %c0_85] : memref<1x4x16x8xbf16, #tpu.memory_space<vmem>>, vector<1x1x16x8xbf16>
    %89 = vector.shape_cast %88 : vector<1x1x16x8xbf16> to vector<16x8xbf16>
    %90 = vector.shape_cast %87 : vector<16x8xbf16> to vector<1x1x16x8xbf16>
    tpu.vector_store %arg8[%c0_82, %c3_83, %c0_84, %c0_85], %90 {strides = array<i32>} : memref<1x4x16x8xbf16, #tpu.memory_space<vmem>>, vector<1x1x16x8xbf16>,
    return
  }
  func.func @transform_0(%arg0: i32, %arg1: i32) -> (i32, i32, i32) {
    %c0_i32 = arith.constant 0 : i32
    %c0_i32_0 = arith.constant 0 : i32
    return %arg0, %arg1, %c0_i32 : i32, i32, i32
  }
  func.func @transform_1(%arg0: i32, %arg1: i32) -> (i32, i32, i32) {
    %c0_i32 = arith.constant 0 : i32
    %c0_i32_0 = arith.constant 0 : i32
    %c0_i32_1 = arith.constant 0 : i32
    %c0_i32_2 = arith.constant 0 : i32
    return %c0_i32, %c0_i32_0, %c0_i32_1 : i32, i32, i32
  }
  func.func @transform_2(%arg0: i32, %arg1: i32) -> (i32, i32, i32) {
    %c0_i32 = arith.constant 0 : i32
    %c0_i32_0 = arith.constant 0 : i32
    %c0_i32_1 = arith.constant 0 : i32
    %c0_i32_2 = arith.constant 0 : i32
    return %c0_i32, %c0_i32_0, %c0_i32_1 : i32, i32, i32
  }
  func.func @transform_3(%arg0: i32, %arg1: i32) -> (i32, i32, i32) {
    %c0_i32 = arith.constant 0 : i32
    %c0_i32_0 = arith.constant 0 : i32
    %c0_i32_1 = arith.constant 0 : i32
    %c0_i32_2 = arith.constant 0 : i32
    return %c0_i32, %c0_i32_0, %c0_i32_1 : i32, i32, i32
  }
  func.func @transform_4(%arg0: i32, %arg1: i32) -> (i32, i32, i32) {
    %c0_i32 = arith.constant 0 : i32
    %c0_i32_0 = arith.constant 0 : i32
    %c0_i32_1 = arith.constant 0 : i32
    %c0_i32_2 = arith.constant 0 : i32
    return %c0_i32, %c0_i32_0, %c0_i32_1 : i32, i32, i32
  }
  func.func @transform_5(%arg0: i32, %arg1: i32) -> (i32, i32, i32, i32) {
    %c0_i32 = arith.constant 0 : i32
    %c0_i32_0 = arith.constant 0 : i32
    %c0_i32_1 = arith.constant 0 : i32
    return %arg0, %c0_i32, %arg1, %c0_i32_0 : i32, i32, i32, i32
  }
  func.func @transform_6(%arg0: i32, %arg1: i32) -> (i32, i32, i32, i32) {
    %c0_i32 = arith.constant 0 : i32
    %c0_i32_0 = arith.constant 0 : i32
    %c0_i32_1 = arith.constant 0 : i32
    return %arg0, %c0_i32, %arg1, %c0_i32_0 : i32, i32, i32, i32
  }
}

</mosaic_0001>

<bundles_post_ra>
// kernel: tpu_custom_call.1
= control target key start
LH: loop header
LB: loop body
LE: loop exit
PB: predicated region body
PF: predicated region fallthrough
CT: control target
= control target key end

     0   :  { %s1384_s21 = smov 0   ;;  %s1386_s22 = smov 0   ;;  %s1572_s0 = inlined_call_operand.vmem [shape: f32[2,16,32], index: 0, kind: input, shape index: {}]   ;;  %s1573_s1 = inlined_call_operand.vmem [shape: bf16[4,32,8], index: 1, kind: input, shape index: {}]   ;;  %s1574_s2 = inlined_call_operand.vmem [shape: bf16[4,32,8], index: 2, kind: input, shape index: {}]   ;;  %s1575_s3 = inlined_call_operand.vmem [shape: f32[4,1,8], index: 3, kind: input, shape index: {}]   ;;  %s1576_s4 = inlined_call_operand.vmem [shape: f32[4,1,8], index: 4, kind: input, shape index: {}]   ;;  %s1577_s5 = inlined_call_operand.vmem [shape: bf16[2,4,16,8], index: 5, kind: output, shape index: {0}]   ;;  %s1578_s6 = inlined_call_operand.vmem [shape: bf16[2,4,16,8], index: 6, kind: output, shape index: {1}]  }
   0x1   :  { %s1388_s23 = smov 0  }
   0x2 LB: > { %s29_s24 = sadd.s32 1, %s1341_s22  ;;  %p1075_p0 = scmp.ge.s32.totalorder %s1345_s23, 1  ;;  %s1345_s23 = sphi %s1388_s23, %s17_s23   ;;  %s1341_s22 = sphi %s1386_s22, %s1580_s22   ;;  %s1337_s21 = sphi %s1384_s21, %s1579_s21  }
   0x3   : > { %p31_p1 = scmp.ge.s32.totalorder %s29_s24, 2  ;;  %p238_p2 = scmp.lt.s32.totalorder %s1345_s23, 3 }
   0x5   : > { %s1582_s24 = smov (%p31_p1, %s29_s24), 0  ;;  %p239_p3 = pnand %p1075_p0, %p238_p2 }
   0x6   : > { %p286_p4 = scmp.lt.s32.totalorder (!%p239_p3), %s1337_s21, 1 }
   0x7   : > { %242 = sbr.rel (%p239_p3) target bundleno = 248 (0xf8), region = 40 }
   0xc   : > { %v1307_v0 = vld [vmem:[%s1573_s1 + $0x8] sm:$0xff]   ;;  %v1347_v1 = vmov 0.0   ;;  %v1309_v3 = vld [vmem:[%s1573_s1] sm:$0xff]   ;;  %vm1348_vm0 = vmmov 0   ;;  %s1584_s21 = smov (!%p286_p4, %s1337_s21), 1  ;;  %v1311_v5 = vld [vmem:[%s1573_s1 + $0x18] sm:$0xff]  }
   0xd   : > { %1217 = vmatprep.subr.bf16.mxu0 %v1347_v1  ;;  %1225 = vmatprep.subr.bf16.mxu1 %v1347_v1  ;;  %v1308_v2 = vld [vmem:[%s1574_s2 + $0x8] sm:$0xff]   ;;  %v1310_v4 = vld [vmem:[%s1574_s2] sm:$0xff]   ;;  %s1174_s9 = sshll.u32 %s1584_s21, 4  ;;  %v1312_v6 = vld [vmem:[%s1574_s2 + $0x18] sm:$0xff]   ;;  %vm342_vm1 = vcmask 261120   ;;  %s1175_s25 = sshll.u32 %s1584_s21, 5 }
   0xe   : > { %1218 = vmatpush3.bf16.msra.mxu0 %v1307_v0  ;;  %1221 = vmatprep.mubr.msk.bf16.mxu0 %vm1348_vm0, %v1347_v1  ;;  %s293_s14 = scalar_lea.vmem %s1572_s0, %s1174_s9  ;;  %v1313_v10 = vld [vmem:[%s1573_s1 + $0x10] sm:$0xff]   ;;  %v1315_v12 = vld [vmem:[%s1573_s1 + $0x28] sm:$0xff]   ;;  %v1317_v14 = vld [vmem:[%s1573_s1 + $0x20] sm:$0xff]   ;;  %s1506_s28 = scalar_lea.vmem %s1577_s5, %s1175_s25  ;;  %vm459_vm2 = vcmask 60416  }
   0xf   : > { %1226 = vmatpush3.bf16.msra.mxu1 %v1308_v2  ;;  %1219 = vmatprep.subr.bf16.mxu0 %v1347_v1  ;;  %v316_v7 = vld [vmem:[%s293_s14] sm:$0xff]  ;;  %v317_v8 = vld [vmem:[%s293_s14 + $0x8] sm:$0xff]  ;;  %v1314_v11 = vld [vmem:[%s1574_s2 + $0x10] sm:$0xff]   ;;  %s1511_s7 = scalar_lea.vmem %s1578_s6, %s1175_s25 }
  0x10   : > { %1227 = vmatprep.subr.bf16.mxu1 %v1347_v1  ;;  %1229 = vmatprep.mubr.msk.bf16.mxu1 %vm1348_vm0, %v1347_v1  ;;  %v318_v9 = vpack.c.bf16 %v317_v8, %v316_v7  ;;  %v1316_v13 = vld [vmem:[%s1574_s2 + $0x28] sm:$0xff]   ;;  %v1318_v15 = vld [vmem:[%s1574_s2 + $0x20] sm:$0xff]   ;;  %v1319_v16 = vld [vmem:[%s1573_s1 + $0x38] sm:$0xff]  }
  0x11   : > { %v1320_v17 = vld [vmem:[%s1574_s2 + $0x38] sm:$0xff]   ;;  %v1321_v18 = vld [vmem:[%s1573_s1 + $0x30] sm:$0xff]   ;;  %v1082_v20 = vld [vmem:[%s1575_s3] ss:$0 sm:$0xff] }
  0x12   : > { %1220 = vmatpush3.bf16.msra.mxu0 %v1309_v3  ;;  %v1322_v19 = vld [vmem:[%s1574_s2 + $0x30] sm:$0xff]   ;;  %v1086_v21 = vld [vmem:[%s1576_s4] ss:$0 sm:$0xff]  ;;  %v1099_v36 = vld [vmem:[%s1575_s3 + $0x1] ss:$0 sm:$0xff] }
  0x13   : > { %1228 = vmatpush3.bf16.msra.mxu1 %v1310_v4  ;;  %1233 = vmatprep.subr.bf16.mxu0 %v1347_v1  ;;  %v1108_v37 = vld [vmem:[%s1576_s4 + $0x1] ss:$0 sm:$0xff]  ;;  %v1125_v54 = vld [vmem:[%s1575_s3 + $0x2] ss:$0 sm:$0xff]  ;;  %v1151_v8 = vld [vmem:[%s1575_s3 + $0x3] ss:$0 sm:$0xff] }
  0x14   : > { %1241 = vmatprep.subr.bf16.mxu1 %v1347_v1  ;;  %v1134_v55 = vld [vmem:[%s1576_s4 + $0x2] ss:$0 sm:$0xff] }
  0x15   : > { %1222 = vmatmul.mubr.msk.bf16.vlgmr.msra.gmra.mxu0 %vm342_vm1, %v318_v9 }
  0x16   : > { %1230 = vmatmul.mubr.msk.bf16.vlgmr.msra.gmra.mxu1 %vm342_vm1, %v318_v9  ;;  %1234 = vmatpush3.bf16.msra.mxu0 %v1311_v5 }
  0x17   : > { %1242 = vmatpush3.bf16.msra.mxu1 %v1312_v6  ;;  %1235 = vmatprep.subr.bf16.mxu0 %v1347_v1 }
  0x18   : > { %1243 = vmatprep.subr.bf16.mxu1 %v1347_v1  ;;  %1237 = vmatprep.mubr.msk.bf16.mxu0 %vm1348_vm0, %v1347_v1 }
  0x19   : > { %1245 = vmatprep.mubr.msk.bf16.mxu1 %vm1348_vm0, %v1347_v1 }
  0x1a   : > { %1236 = vmatpush3.bf16.msra.mxu0 %v1313_v10 }
  0x1b   : > { %1244 = vmatpush3.bf16.msra.mxu1 %v1314_v11  ;;  %1249 = vmatprep.subr.bf16.mxu0 %v1347_v1 }
  0x1c   : > { %1257 = vmatprep.subr.bf16.mxu1 %v1347_v1 }
  0x1d   : > { %1238 = vmatmul.mubr.msk.bf16.vlgmr.msra.gmra.mxu0 %vm342_vm1, %v318_v9 }
  0x1e   : > { %1246 = vmatmul.mubr.msk.bf16.vlgmr.msra.gmra.mxu1 %vm342_vm1, %v318_v9  ;;  %1250 = vmatpush3.bf16.msra.mxu0 %v1315_v12 }
  0x1f   : > { %1258 = vmatpush3.bf16.msra.mxu1 %v1316_v13  ;;  %1251 = vmatprep.subr.bf16.mxu0 %v1347_v1 }
  0x20   : > { %1259 = vmatprep.subr.bf16.mxu1 %v1347_v1  ;;  %1253 = vmatprep.mubr.msk.bf16.mxu0 %vm1348_vm0, %v1347_v1 }
  0x21   : > { %1261 = vmatprep.mubr.msk.bf16.mxu1 %vm1348_vm0, %v1347_v1 }
  0x22   : > { %1252 = vmatpush3.bf16.msra.mxu0 %v1317_v14 }
  0x23   : > { %1260 = vmatpush3.bf16.msra.mxu1 %v1318_v15  ;;  %1265 = vmatprep.subr.bf16.mxu0 %v1347_v1 }
  0x24   : > { %1273 = vmatprep.subr.bf16.mxu1 %v1347_v1 }
  0x25   : > { %1254 = vmatmul.mubr.msk.bf16.vlgmr.msra.gmra.mxu0 %vm342_vm1, %v318_v9 }
  0x26   : > { %1262 = vmatmul.mubr.msk.bf16.vlgmr.msra.gmra.mxu1 %vm342_vm1, %v318_v9  ;;  %1266 = vmatpush3.bf16.msra.mxu0 %v1319_v16 }
  0x27   : > { %1274 = vmatpush3.bf16.msra.mxu1 %v1320_v17  ;;  %1267 = vmatprep.subr.bf16.mxu0 %v1347_v1 }
  0x28   : > { %1275 = vmatprep.subr.bf16.mxu1 %v1347_v1  ;;  %1269 = vmatprep.mubr.msk.bf16.mxu0 %vm1348_vm0, %v1347_v1 }
  0x29   : > { %1277 = vmatprep.mubr.msk.bf16.mxu1 %vm1348_vm0, %v1347_v1 }
  0x2a   : > { %1268 = vmatpush3.bf16.msra.mxu0 %v1321_v18 }
  0x2b   : > { %1276 = vmatpush3.bf16.msra.mxu1 %v1322_v19 }
  0x2d   : > { %1270 = vmatmul.mubr.msk.bf16.vlgmr.msra.gmra.mxu0 %vm342_vm1, %v318_v9 }
  0x2e   : > { %1278 = vmatmul.mubr.msk.bf16.vlgmr.msra.gmra.mxu1 %vm342_vm1, %v318_v9  ;;  %v1160_v9 = vld [vmem:[%s1576_s4 + $0x3] ss:$0 sm:$0xff] }
  0xd5   : > { %v380_v22 = vpop.f32.mrf.mxu0 }
  0xd6   : > { %v444_v23 = vpop.f32.mrf.mxu1  ;;  %v381_v24 = vadd.f32 %v1082_v20, %v380_v22 }
  0xd7   : > { %v445_v25 = vadd.f32 %v1086_v21, %v444_v23  ;;  %v1223_v26 = vpop.f32.mrf.mxu0 }
  0xd8   : > { %v1231_v27 = vpop.f32.mrf.mxu1  ;;  %v1177_v28 = vpack.c.bf16 %v381_v24, %v381_v24 }
  0xd9   : > { %v1179_v29 = vpack.c.bf16 %v445_v25, %v445_v25  ;;  %v383_v30 = vpop.f32.mrf.mxu0 }
  0xda   : > { %v447_v31 = vpop.f32.mrf.mxu1  ;;  %460 = vst.msk [vmem:[%s1506_s28] sm:$0xf] %vm459_vm2, %v1177_v28  ;;  %v384_v32 = vadd.f32 %v1082_v20, %v383_v30 }
  0xdb   : > { %470 = vst.msk [vmem:[%s1511_s7] sm:$0xf] %vm459_vm2, %v1179_v29  ;;  %v448_v33 = vadd.f32 %v1086_v21, %v447_v31  ;;  %v1224_v34 = vpop.f32.mrf.mxu0 }
  0xdc   : > { %v1232_v35 = vpop.f32.mrf.mxu1  ;;  %v1178_v38 = vpack.c.bf16 %v384_v32, %v384_v32 }
  0xdd   : > { %v1180_v39 = vpack.c.bf16 %v448_v33, %v448_v33  ;;  %v531_v40 = vpop.f32.mrf.mxu0 }
  0xde   : > { %v597_v41 = vpop.f32.mrf.mxu1  ;;  %461 = vst.msk [vmem:[%s1506_s28 + $0x4] sm:$0xf] %vm459_vm2, %v1178_v38  ;;  %v532_v42 = vadd.f32 %v1099_v36, %v531_v40 }
  0xdf   : > { %471 = vst.msk [vmem:[%s1511_s7 + $0x4] sm:$0xf] %vm459_vm2, %v1180_v39  ;;  %v598_v43 = vadd.f32 %v1108_v37, %v597_v41  ;;  %v1239_v44 = vpop.f32.mrf.mxu0 }
  0xe0   : > { %v1247_v45 = vpop.f32.mrf.mxu1  ;;  %v1181_v46 = vpack.c.bf16 %v532_v42, %v532_v42 }
  0xe1   : > { %v1183_v47 = vpack.c.bf16 %v598_v43, %v598_v43  ;;  %v534_v48 = vpop.f32.mrf.mxu0 }
  0xe2   : > { %v600_v49 = vpop.f32.mrf.mxu1  ;;  %1114 = vst.msk [vmem:[%s1506_s28 + $0x8] sm:$0xf] %vm459_vm2, %v1181_v46  ;;  %v535_v50 = vadd.f32 %v1099_v36, %v534_v48 }
  0xe3   : > { %1118 = vst.msk [vmem:[%s1511_s7 + $0x8] sm:$0xf] %vm459_vm2, %v1183_v47  ;;  %v601_v51 = vadd.f32 %v1108_v37, %v600_v49  ;;  %v1240_v52 = vpop.f32.mrf.mxu0 }
  0xe4   : > { %v1248_v53 = vpop.f32.mrf.mxu1  ;;  %v1182_v56 = vpack.c.bf16 %v535_v50, %v535_v50 }
  0xe5   : > { %v1184_v57 = vpack.c.bf16 %v601_v51, %v601_v51  ;;  %v685_v58 = vpop.f32.mrf.mxu0 }
  0xe6   : > { %v751_v59 = vpop.f32.mrf.mxu1  ;;  %1115 = vst.msk [vmem:[%s1506_s28 + $0xc] sm:$0xf] %vm459_vm2, %v1182_v56  ;;  %v686_v60 = vadd.f32 %v1125_v54, %v685_v58 }
  0xe7   : > { %1119 = vst.msk [vmem:[%s1511_s7 + $0xc] sm:$0xf] %vm459_vm2, %v1184_v57  ;;  %v752_v61 = vadd.f32 %v1134_v55, %v751_v59  ;;  %v1255_v62 = vpop.f32.mrf.mxu0 }
  0xe8   : > { %v1263_v63 = vpop.f32.mrf.mxu1  ;;  %v1185_v0 = vpack.c.bf16 %v686_v60, %v686_v60 }
  0xe9   : > { %v1187_v1 = vpack.c.bf16 %v752_v61, %v752_v61  ;;  %v688_v2 = vpop.f32.mrf.mxu0 }
  0xea   : > { %v754_v3 = vpop.f32.mrf.mxu1  ;;  %1140 = vst.msk [vmem:[%s1506_s28 + $0x10] sm:$0xf] %vm459_vm2, %v1185_v0  ;;  %v689_v4 = vadd.f32 %v1125_v54, %v688_v2 }
  0xeb   : > { %1144 = vst.msk [vmem:[%s1511_s7 + $0x10] sm:$0xf] %vm459_vm2, %v1187_v1  ;;  %v755_v5 = vadd.f32 %v1134_v55, %v754_v3  ;;  %v1256_v6 = vpop.f32.mrf.mxu0 }
  0xec   : > { %v1264_v7 = vpop.f32.mrf.mxu1  ;;  %v1186_v10 = vpack.c.bf16 %v689_v4, %v689_v4 }
  0xed   : > { %v1188_v11 = vpack.c.bf16 %v755_v5, %v755_v5  ;;  %v839_v12 = vpop.f32.mrf.mxu0 }
  0xee   : > { %v905_v13 = vpop.f32.mrf.mxu1  ;;  %1141 = vst.msk [vmem:[%s1506_s28 + $0x14] sm:$0xf] %vm459_vm2, %v1186_v10  ;;  %v840_v14 = vadd.f32 %v1151_v8, %v839_v12 }
  0xef   : > { %1145 = vst.msk [vmem:[%s1511_s7 + $0x14] sm:$0xf] %vm459_vm2, %v1188_v11  ;;  %v906_v15 = vadd.f32 %v1160_v9, %v905_v13  ;;  %v1271_v16 = vpop.f32.mrf.mxu0 }
  0xf0   : > { %v1279_v17 = vpop.f32.mrf.mxu1  ;;  %v1189_v18 = vpack.c.bf16 %v840_v14, %v840_v14 }
  0xf1   : > { %v1191_v19 = vpack.c.bf16 %v906_v15, %v906_v15  ;;  %v842_v20 = vpop.f32.mrf.mxu0 }
  0xf2   : > { %v908_v21 = vpop.f32.mrf.mxu1  ;;  %1166 = vst.msk [vmem:[%s1506_s28 + $0x18] sm:$0xf] %vm459_vm2, %v1189_v18  ;;  %v843_v22 = vadd.f32 %v1151_v8, %v842_v20 }
  0xf3   : > { %1170 = vst.msk [vmem:[%s1511_s7 + $0x18] sm:$0xf] %vm459_vm2, %v1191_v19  ;;  %v909_v23 = vadd.f32 %v1160_v9, %v908_v21  ;;  %v1272_v24 = vpop.f32.mrf.mxu0 }
  0xf4   : > { %v1280_v25 = vpop.f32.mrf.mxu1  ;;  %v1190_v26 = vpack.c.bf16 %v843_v22, %v843_v22 }
  0xf5   : > { %v1192_v27 = vpack.c.bf16 %v909_v23, %v909_v23 }
  0xf6   : > { %1167 = vst.msk [vmem:[%s1506_s28 + $0x1c] sm:$0xf] %vm459_vm2, %v1190_v26 }
  0xf7   : > { %1171 = vst.msk [vmem:[%s1511_s7 + $0x1c] sm:$0xf] %vm459_vm2, %v1192_v27 }
  0xf8 PF: > { %s17_s23 = sadd.s32 1, %s1345_s23   ;;  %s1579_s21 = smov %s1341_s22 }
  0xf9   : > { %p14_p5 = scmp.ge.s32.totalorder %s17_s23, 4   ;;  %s1580_s22 = smov %s1582_s24 }
  0xfb   :  { %16 = sbr.rel (!%p14_p5) target bundleno = 2 (0x2), region = 100 }

// kernel: tpu_custom_call.1
= control target key start
LH: loop header
LB: loop body
LE: loop exit
PB: predicated region body
PF: predicated region fallthrough
CT: control target
= control target key end

     0   :  { %s1384_s21 = smov 0   ;;  %s1386_s22 = smov 0   ;;  %s1572_s0 = inlined_call_operand.vmem [shape: f32[2,16,32], index: 0, kind: input, shape index: {}]   ;;  %s1573_s1 = inlined_call_operand.vmem [shape: bf16[4,32,8], index: 1, kind: input, shape index: {}]   ;;  %s1574_s2 = inlined_call_operand.vmem [shape: bf16[4,32,8], index: 2, kind: input, shape index: {}]   ;;  %s1575_s3 = inlined_call_operand.vmem [shape: f32[4,1,8], index: 3, kind: input, shape index: {}]   ;;  %s1576_s4 = inlined_call_operand.vmem [shape: f32[4,1,8], index: 4, kind: input, shape index: {}]   ;;  %s1577_s5 = inlined_call_operand.vmem [shape: bf16[2,4,16,8], index: 5, kind: output, shape index: {0}]   ;;  %s1578_s6 = inlined_call_operand.vmem [shape: bf16[2,4,16,8], index: 6, kind: output, shape index: {1}]  }
   0x1   :  { %s1388_s23 = smov 0  }
   0x2 LB: > { %s29_s24 = sadd.s32 1, %s1341_s22  ;;  %p1075_p0 = scmp.ge.s32.totalorder %s1345_s23, 1  ;;  %s1345_s23 = sphi %s1388_s23, %s17_s23   ;;  %s1341_s22 = sphi %s1386_s22, %s1580_s22   ;;  %s1337_s21 = sphi %s1384_s21, %s1579_s21  }
   0x3   : > { %p31_p1 = scmp.ge.s32.totalorder %s29_s24, 2  ;;  %p238_p2 = scmp.lt.s32.totalorder %s1345_s23, 3 }
   0x5   : > { %s1582_s24 = smov (%p31_p1, %s29_s24), 0  ;;  %p239_p3 = pnand %p1075_p0, %p238_p2 }
   0x6   : > { %p286_p4 = scmp.lt.s32.totalorder (!%p239_p3), %s1337_s21, 1 }
   0x7   : > { %242 = sbr.rel (%p239_p3) target bundleno = 248 (0xf8), region = 40 }
   0xc   : > { %v1307_v0 = vld [vmem:[%s1573_s1 + $0x8] sm:$0xff]   ;;  %v1347_v1 = vmov 0.0   ;;  %v1309_v3 = vld [vmem:[%s1573_s1] sm:$0xff]   ;;  %vm1348_vm0 = vmmov 0   ;;  %s1584_s21 = smov (!%p286_p4, %s1337_s21), 1  ;;  %v1311_v5 = vld [vmem:[%s1573_s1 + $0x18] sm:$0xff]  }
   0xd   : > { %1217 = vmatprep.subr.bf16.mxu0 %v1347_v1  ;;  %1225 = vmatprep.subr.bf16.mxu1 %v1347_v1  ;;  %v1308_v2 = vld [vmem:[%s1574_s2 + $0x8] sm:$0xff]   ;;  %v1310_v4 = vld [vmem:[%s1574_s2] sm:$0xff]   ;;  %s1174_s9 = sshll.u32 %s1584_s21, 4  ;;  %v1312_v6 = vld [vmem:[%s1574_s2 + $0x18] sm:$0xff]   ;;  %vm342_vm1 = vcmask 261120   ;;  %s1175_s25 = sshll.u32 %s1584_s21, 5 }
   0xe   : > { %1218 = vmatpush3.bf16.msra.mxu0 %v1307_v0  ;;  %1221 = vmatprep.mubr.msk.bf16.mxu0 %vm1348_vm0, %v1347_v1  ;;  %s293_s14 = scalar_lea.vmem %s1572_s0, %s1174_s9  ;;  %v1313_v10 = vld [vmem:[%s1573_s1 + $0x10] sm:$0xff]   ;;  %v1315_v12 = vld [vmem:[%s1573_s1 + $0x28] sm:$0xff]   ;;  %v1317_v14 = vld [vmem:[%s1573_s1 + $0x20] sm:$0xff]   ;;  %s1506_s28 = scalar_lea.vmem %s1577_s5, %s1175_s25  ;;  %vm459_vm2 = vcmask 60416  }
   0xf   : > { %1226 = vmatpush3.bf16.msra.mxu1 %v1308_v2  ;;  %1219 = vmatprep.subr.bf16.mxu0 %v1347_v1  ;;  %v316_v7 = vld [vmem:[%s293_s14] sm:$0xff]  ;;  %v317_v8 = vld [vmem:[%s293_s14 + $0x8] sm:$0xff]  ;;  %v1314_v11 = vld [vmem:[%s1574_s2 + $0x10] sm:$0xff]   ;;  %s1511_s7 = scalar_lea.vmem %s1578_s6, %s1175_s25 }
  0x10   : > { %1227 = vmatprep.subr.bf16.mxu1 %v1347_v1  ;;  %1229 = vmatprep.mubr.msk.bf16.mxu1 %vm1348_vm0, %v1347_v1  ;;  %v318_v9 = vpack.c.bf16 %v317_v8, %v316_v7  ;;  %v1316_v13 = vld [vmem:[%s1574_s2 + $0x28] sm:$0xff]   ;;  %v1318_v15 = vld [vmem:[%s1574_s2 + $0x20] sm:$0xff]   ;;  %v1319_v16 = vld [vmem:[%s1573_s1 + $0x38] sm:$0xff]  }
  0x11   : > { %v1320_v17 = vld [vmem:[%s1574_s2 + $0x38] sm:$0xff]   ;;  %v1321_v18 = vld [vmem:[%s1573_s1 + $0x30] sm:$0xff]   ;;  %v1082_v20 = vld [vmem:[%s1575_s3] ss:$0 sm:$0xff] }
  0x12   : > { %1220 = vmatpush3.bf16.msra.mxu0 %v1309_v3  ;;  %v1322_v19 = vld [vmem:[%s1574_s2 + $0x30] sm:$0xff]   ;;  %v1086_v21 = vld [vmem:[%s1576_s4] ss:$0 sm:$0xff]  ;;  %v1099_v36 = vld [vmem:[%s1575_s3 + $0x1] ss:$0 sm:$0xff] }
  0x13   : > { %1228 = vmatpush3.bf16.msra.mxu1 %v1310_v4  ;;  %1233 = vmatprep.subr.bf16.mxu0 %v1347_v1  ;;  %v1108_v37 = vld [vmem:[%s1576_s4 + $0x1] ss:$0 sm:$0xff]  ;;  %v1125_v54 = vld [vmem:[%s1575_s3 + $0x2] ss:$0 sm:$0xff]  ;;  %v1151_v8 = vld [vmem:[%s1575_s3 + $0x3] ss:$0 sm:$0xff] }
  0x14   : > { %1241 = vmatprep.subr.bf16.mxu1 %v1347_v1  ;;  %v1134_v55 = vld [vmem:[%s1576_s4 + $0x2] ss:$0 sm:$0xff] }
  0x15   : > { %1222 = vmatmul.mubr.msk.bf16.vlgmr.msra.gmra.mxu0 %vm342_vm1, %v318_v9 }
  0x16   : > { %1230 = vmatmul.mubr.msk.bf16.vlgmr.msra.gmra.mxu1 %vm342_vm1, %v318_v9  ;;  %1234 = vmatpush3.bf16.msra.mxu0 %v1311_v5 }
  0x17   : > { %1242 = vmatpush3.bf16.msra.mxu1 %v1312_v6  ;;  %1235 = vmatprep.subr.bf16.mxu0 %v1347_v1 }
  0x18   : > { %1243 = vmatprep.subr.bf16.mxu1 %v1347_v1  ;;  %1237 = vmatprep.mubr.msk.bf16.mxu0 %vm1348_vm0, %v1347_v1 }
  0x19   : > { %1245 = vmatprep.mubr.msk.bf16.mxu1 %vm1348_vm0, %v1347_v1 }
  0x1a   : > { %1236 = vmatpush3.bf16.msra.mxu0 %v1313_v10 }
  0x1b   : > { %1244 = vmatpush3.bf16.msra.mxu1 %v1314_v11  ;;  %1249 = vmatprep.subr.bf16.mxu0 %v1347_v1 }
  0x1c   : > { %1257 = vmatprep.subr.bf16.mxu1 %v1347_v1 }
  0x1d   : > { %1238 = vmatmul.mubr.msk.bf16.vlgmr.msra.gmra.mxu0 %vm342_vm1, %v318_v9 }
  0x1e   : > { %1246 = vmatmul.mubr.msk.bf16.vlgmr.msra.gmra.mxu1 %vm342_vm1, %v318_v9  ;;  %1250 = vmatpush3.bf16.msra.mxu0 %v1315_v12 }
  0x1f   : > { %1258 = vmatpush3.bf16.msra.mxu1 %v1316_v13  ;;  %1251 = vmatprep.subr.bf16.mxu0 %v1347_v1 }
  0x20   : > { %1259 = vmatprep.subr.bf16.mxu1 %v1347_v1  ;;  %1253 = vmatprep.mubr.msk.bf16.mxu0 %vm1348_vm0, %v1347_v1 }
  0x21   : > { %1261 = vmatprep.mubr.msk.bf16.mxu1 %vm1348_vm0, %v1347_v1 }
  0x22   : > { %1252 = vmatpush3.bf16.msra.mxu0 %v1317_v14 }
  0x23   : > { %1260 = vmatpush3.bf16.msra.mxu1 %v1318_v15  ;;  %1265 = vmatprep.subr.bf16.mxu0 %v1347_v1 }
  0x24   : > { %1273 = vmatprep.subr.bf16.mxu1 %v1347_v1 }
  0x25   : > { %1254 = vmatmul.mubr.msk.bf16.vlgmr.msra.gmra.mxu0 %vm342_vm1, %v318_v9 }
  0x26   : > { %1262 = vmatmul.mubr.msk.bf16.vlgmr.msra.gmra.mxu1 %vm342_vm1, %v318_v9  ;;  %1266 = vmatpush3.bf16.msra.mxu0 %v1319_v16 }
  0x27   : > { %1274 = vmatpush3.bf16.msra.mxu1 %v1320_v17  ;;  %1267 = vmatprep.subr.bf16.mxu0 %v1347_v1 }
  0x28   : > { %1275 = vmatprep.subr.bf16.mxu1 %v1347_v1  ;;  %1269 = vmatprep.mubr.msk.bf16.mxu0 %vm1348_vm0, %v1347_v1 }
  0x29   : > { %1277 = vmatprep.mubr.msk.bf16.mxu1 %vm1348_vm0, %v1347_v1 }
  0x2a   : > { %1268 = vmatpush3.bf16.msra.mxu0 %v1321_v18 }
  0x2b   : > { %1276 = vmatpush3.bf16.msra.mxu1 %v1322_v19 }
  0x2d   : > { %1270 = vmatmul.mubr.msk.bf16.vlgmr.msra.gmra.mxu0 %vm342_vm1, %v318_v9 }
  0x2e   : > { %1278 = vmatmul.mubr.msk.bf16.vlgmr.msra.gmra.mxu1 %vm342_vm1, %v318_v9  ;;  %v1160_v9 = vld [vmem:[%s1576_s4 + $0x3] ss:$0 sm:$0xff] }
  0xd5   : > { %v380_v22 = vpop.f32.mrf.mxu0 }
  0xd6   : > { %v444_v23 = vpop.f32.mrf.mxu1  ;;  %v381_v24 = vadd.f32 %v1082_v20, %v380_v22 }
  0xd7   : > { %v445_v25 = vadd.f32 %v1086_v21, %v444_v23  ;;  %v1223_v26 = vpop.f32.mrf.mxu0 }
  0xd8   : > { %v1231_v27 = vpop.f32.mrf.mxu1  ;;  %v1177_v28 = vpack.c.bf16 %v381_v24, %v381_v24 }
  0xd9   : > { %v1179_v29 = vpack.c.bf16 %v445_v25, %v445_v25  ;;  %v383_v30 = vpop.f32.mrf.mxu0 }
  0xda   : > { %v447_v31 = vpop.f32.mrf.mxu1  ;;  %460 = vst.msk [vmem:[%s1506_s28] sm:$0xf] %vm459_vm2, %v1177_v28  ;;  %v384_v32 = vadd.f32 %v1082_v20, %v383_v30 }
  0xdb   : > { %470 = vst.msk [vmem:[%s1511_s7] sm:$0xf] %vm459_vm2, %v1179_v29  ;;  %v448_v33 = vadd.f32 %v1086_v21, %v447_v31  ;;  %v1224_v34 = vpop.f32.mrf.mxu0 }
  0xdc   : > { %v1232_v35 = vpop.f32.mrf.mxu1  ;;  %v1178_v38 = vpack.c.bf16 %v384_v32, %v384_v32 }
  0xdd   : > { %v1180_v39 = vpack.c.bf16 %v448_v33, %v448_v33  ;;  %v531_v40 = vpop.f32.mrf.mxu0 }
  0xde   : > { %v597_v41 = vpop.f32.mrf.mxu1  ;;  %461 = vst.msk [vmem:[%s1506_s28 + $0x4] sm:$0xf] %vm459_vm2, %v1178_v38  ;;  %v532_v42 = vadd.f32 %v1099_v36, %v531_v40 }
  0xdf   : > { %471 = vst.msk [vmem:[%s1511_s7 + $0x4] sm:$0xf] %vm459_vm2, %v1180_v39  ;;  %v598_v43 = vadd.f32 %v1108_v37, %v597_v41  ;;  %v1239_v44 = vpop.f32.mrf.mxu0 }
  0xe0   : > { %v1247_v45 = vpop.f32.mrf.mxu1  ;;  %v1181_v46 = vpack.c.bf16 %v532_v42, %v532_v42 }
  0xe1   : > { %v1183_v47 = vpack.c.bf16 %v598_v43, %v598_v43  ;;  %v534_v48 = vpop.f32.mrf.mxu0 }
  0xe2   : > { %v600_v49 = vpop.f32.mrf.mxu1  ;;  %1114 = vst.msk [vmem:[%s1506_s28 + $0x8] sm:$0xf] %vm459_vm2, %v1181_v46  ;;  %v535_v50 = vadd.f32 %v1099_v36, %v534_v48 }
  0xe3   : > { %1118 = vst.msk [vmem:[%s1511_s7 + $0x8] sm:$0xf] %vm459_vm2, %v1183_v47  ;;  %v601_v51 = vadd.f32 %v1108_v37, %v600_v49  ;;  %v1240_v52 = vpop.f32.mrf.mxu0 }
  0xe4   : > { %v1248_v53 = vpop.f32.mrf.mxu1  ;;  %v1182_v56 = vpack.c.bf16 %v535_v50, %v535_v50 }
  0xe5   : > { %v1184_v57 = vpack.c.bf16 %v601_v51, %v601_v51  ;;  %v685_v58 = vpop.f32.mrf.mxu0 }
  0xe6   : > { %v751_v59 = vpop.f32.mrf.mxu1  ;;  %1115 = vst.msk [vmem:[%s1506_s28 + $0xc] sm:$0xf] %vm459_vm2, %v1182_v56  ;;  %v686_v60 = vadd.f32 %v1125_v54, %v685_v58 }
  0xe7   : > { %1119 = vst.msk [vmem:[%s1511_s7 + $0xc] sm:$0xf] %vm459_vm2, %v1184_v57  ;;  %v752_v61 = vadd.f32 %v1134_v55, %v751_v59  ;;  %v1255_v62 = vpop.f32.mrf.mxu0 }
  0xe8   : > { %v1263_v63 = vpop.f32.mrf.mxu1  ;;  %v1185_v0 = vpack.c.bf16 %v686_v60, %v686_v60 }
  0xe9   : > { %v1187_v1 = vpack.c.bf16 %v752_v61, %v752_v61  ;;  %v688_v2 = vpop.f32.mrf.mxu0 }
  0xea   : > { %v754_v3 = vpop.f32.mrf.mxu1  ;;  %1140 = vst.msk [vmem:[%s1506_s28 + $0x10] sm:$0xf] %vm459_vm2, %v1185_v0  ;;  %v689_v4 = vadd.f32 %v1125_v54, %v688_v2 }
  0xeb   : > { %1144 = vst.msk [vmem:[%s1511_s7 + $0x10] sm:$0xf] %vm459_vm2, %v1187_v1  ;;  %v755_v5 = vadd.f32 %v1134_v55, %v754_v3  ;;  %v1256_v6 = vpop.f32.mrf.mxu0 }
  0xec   : > { %v1264_v7 = vpop.f32.mrf.mxu1  ;;  %v1186_v10 = vpack.c.bf16 %v689_v4, %v689_v4 }
  0xed   : > { %v1188_v11 = vpack.c.bf16 %v755_v5, %v755_v5  ;;  %v839_v12 = vpop.f32.mrf.mxu0 }
  0xee   : > { %v905_v13 = vpop.f32.mrf.mxu1  ;;  %1141 = vst.msk [vmem:[%s1506_s28 + $0x14] sm:$0xf] %vm459_vm2, %v1186_v10  ;;  %v840_v14 = vadd.f32 %v1151_v8, %v839_v12 }
  0xef   : > { %1145 = vst.msk [vmem:[%s1511_s7 + $0x14] sm:$0xf] %vm459_vm2, %v1188_v11  ;;  %v906_v15 = vadd.f32 %v1160_v9, %v905_v13  ;;  %v1271_v16 = vpop.f32.mrf.mxu0 }
  0xf0   : > { %v1279_v17 = vpop.f32.mrf.mxu1  ;;  %v1189_v18 = vpack.c.bf16 %v840_v14, %v840_v14 }
  0xf1   : > { %v1191_v19 = vpack.c.bf16 %v906_v15, %v906_v15  ;;  %v842_v20 = vpop.f32.mrf.mxu0 }
  0xf2   : > { %v908_v21 = vpop.f32.mrf.mxu1  ;;  %1166 = vst.msk [vmem:[%s1506_s28 + $0x18] sm:$0xf] %vm459_vm2, %v1189_v18  ;;  %v843_v22 = vadd.f32 %v1151_v8, %v842_v20 }
  0xf3   : > { %1170 = vst.msk [vmem:[%s1511_s7 + $0x18] sm:$0xf] %vm459_vm2, %v1191_v19  ;;  %v909_v23 = vadd.f32 %v1160_v9, %v908_v21  ;;  %v1272_v24 = vpop.f32.mrf.mxu0 }
  0xf4   : > { %v1280_v25 = vpop.f32.mrf.mxu1  ;;  %v1190_v26 = vpack.c.bf16 %v843_v22, %v843_v22 }
  0xf5   : > { %v1192_v27 = vpack.c.bf16 %v909_v23, %v909_v23 }
  0xf6   : > { %1167 = vst.msk [vmem:[%s1506_s28 + $0x1c] sm:$0xf] %vm459_vm2, %v1190_v26 }
  0xf7   : > { %1171 = vst.msk [vmem:[%s1511_s7 + $0x1c] sm:$0xf] %vm459_vm2, %v1192_v27 }
  0xf8 PF: > { %s17_s23 = sadd.s32 1, %s1345_s23   ;;  %s1579_s21 = smov %s1341_s22 }
  0xf9   : > { %p14_p5 = scmp.ge.s32.totalorder %s17_s23, 4   ;;  %s1580_s22 = smov %s1582_s24 }
  0xfb   :  { %16 = sbr.rel (!%p14_p5) target bundleno = 2 (0x2), region = 100 }

</bundles_post_ra>
